<compile_context>
chip_gen: v5e
topology: v5e:2x2
jax: 0.10.0
libtpu: 0.0.40
codegen_flags: <defaults>
</compile_context>

<pallas_src>
import functools

import jax
import jax.numpy as jnp
from jax import lax
from jax.experimental import pallas as pl
from jax.experimental.pallas import tpu as pltpu

LANE = 128
SUBLANE = 8
_VMEM_BUDGET = 40 * 1024 * 1024   # keep per-grid-step footprint well under v7x's 64 MiB physical


def _round_up(n, m):
    return ((n + m - 1) // m) * m


def _vmem_limit(est_bytes):
    # Generous scoped-VMEM limit derived from the actual estimate (defaults are
    # 16/32 MiB and get hit long before physical capacity for moderate T).
    return int(min(max(2 * est_bytes, 32 << 20), 100 << 20))


# ------------------------------------------------------------------
# Shared LSTM cell math.  Packed gate column order is (i, f, o, g) so the three
# sigmoid gates are one contiguous 3*Hp lane block (one EUP dispatch).
# ------------------------------------------------------------------
def _cell(gates, c_prev, Hp):
    act = jax.nn.sigmoid(gates[:, : 3 * Hp])      # [i | f | o]
    g_g = jnp.tanh(gates[:, 3 * Hp: 4 * Hp])
    i_g = act[:, 0 * Hp:1 * Hp]
    f_g = act[:, 1 * Hp:2 * Hp]
    o_g = act[:, 2 * Hp:3 * Hp]
    c_new = f_g * c_prev + i_g * g_g
    h_new = o_g * jnp.tanh(c_new)
    return h_new, c_new


# ------------------------------------------------------------------
# Kernel 1: inner bidirectional LSTM layer (emits the full (T, bt, 2Hp) sequence).
# ------------------------------------------------------------------
def _bilstm_inner_kernel(x_ref, wih_f_ref, wih_b_ref, b_f_ref, b_b_ref, whh_bd_ref,
                         out_ref, xg_f_sc, xg_b_sc, h_sc, c_sc, *, chunk_t):
    # x_ref:      (T, bt, Ip)
    # wih_*:      (Ip, 4*Hp)   gate order (i, f, o, g), zero-padded columns
    # b_*:        (1, 4*Hp)    combined bias (b_ih + b_hh)
    # whh_bd_ref: (2*Hp, 8*Hp) blockdiag(Whh_f, Whh_b) -> one K=2Hp recurrent matmul
    # out_ref:    (T, bt, 2*Hp)
    T, bt, Ip = x_ref.shape
    Hp = whh_bd_ref.shape[0] // 2
    CT = chunk_t
    ncc = T // CT

    h_sc[...] = jnp.zeros_like(h_sc)
    c_sc[...] = jnp.zeros_like(c_sc)

    @pl.loop(0, ncc)
    def _(c):
        f_start = pl.multiple_of(c * CT, CT)                 # fwd chunk (ascending)
        b_start = pl.multiple_of((ncc - 1 - c) * CT, CT)     # bwd chunk (tail-first)

        # Streamed input projection for this chunk (MXU work amortized over CT steps).
        x_f = x_ref[pl.ds(f_start, CT)].reshape(CT * bt, Ip)
        x_b = x_ref[pl.ds(b_start, CT)].reshape(CT * bt, Ip)
        xg_f_sc[...] = (jnp.dot(x_f, wih_f_ref[...], preferred_element_type=jnp.float32)
                        + b_f_ref[...]).reshape(CT, bt, 4 * Hp)
        xg_b_sc[...] = (jnp.dot(x_b, wih_b_ref[...], preferred_element_type=jnp.float32)
                        + b_b_ref[...]).reshape(CT, bt, 4 * Hp)

        @pl.loop(0, CT)
        def _(s):
            t = f_start + s            # position processed by fwd this step
            tb = T - 1 - t             # position processed by bwd this step

            # Single fused recurrent matmul for both directions (K = 2*Hp = 256).
            rec = jnp.dot(h_sc[...], whh_bd_ref[...],
                          preferred_element_type=jnp.float32)
            gates_f = rec[:, : 4 * Hp] + xg_f_sc[s]
            gates_b = rec[:, 4 * Hp:] + xg_b_sc[CT - 1 - s]

            c_all = c_sc[...]
            h_f, c_f = _cell(gates_f, c_all[:, :Hp], Hp)
            h_b, c_b = _cell(gates_b, c_all[:, Hp:], Hp)

            h_sc[...] = jnp.concatenate([h_f, h_b], axis=1)
            c_sc[...] = jnp.concatenate([c_f, c_b], axis=1)

            out_ref[t, :, pl.ds(0, Hp)] = h_f.astype(out_ref.dtype)
            out_ref[tb, :, pl.ds(Hp, Hp)] = h_b.astype(out_ref.dtype)


def _inner_vmem_bytes(T, bt, Ip, Hp, CT):
    blocks = T * bt * Ip + T * bt * 2 * Hp                       # x + out (double-buffered)
    weights = 2 * Ip * 4 * Hp + 2 * 4 * Hp + 2 * Hp * 8 * Hp
    scratch = 2 * CT * bt * 4 * Hp + 2 * bt * 2 * Hp
    return (2 * (blocks + weights) + scratch) * 4


def _choose_tiling(Bp, T, vmem_fn, budget=_VMEM_BUDGET):
    bts = [d for d in range(Bp, 0, -1) if Bp % d == 0 and d % SUBLANE == 0] or [Bp]
    cts = [d for d in range(min(T, 32), 0, -1) if T % d == 0] or [1]
    for bt in bts:                    # prefer the biggest batch tile that fits
        for ct in cts:
            if vmem_fn(bt, ct) <= budget:
                return bt, ct
    # TODO(synk): for very long T with tiny batch the (T, bt, *) blocks may still
    #             exceed VMEM; chunk T with a carried-state grid axis in that case.
    return bts[-1], cts[-1]


def bilstm_inner_layer(x_p, layer, Hp):
    """x_p: (T, Bp, Ip) padded, time-major -> (T, Bp, 2*Hp)."""
    T, Bp, Ip = x_p.shape
    bt, CT = _choose_tiling(Bp, T, lambda b, c: _inner_vmem_bytes(T, b, Ip, Hp, c))
    est = _inner_vmem_bytes(T, bt, Ip, Hp, CT)
    kernel = functools.partial(_bilstm_inner_kernel, chunk_t=CT)

    def const(shape):
        return pl.BlockSpec(shape, lambda b, _s=shape: tuple(0 for _ in _s))

    return pl.pallas_call(
        kernel,
        out_shape=jax.ShapeDtypeStruct((T, Bp, 2 * Hp), jnp.float32),
        grid=(Bp // bt,),
        in_specs=[
            pl.BlockSpec((T, bt, Ip), lambda b: (0, b, 0)),
            const(layer["wih_f"].shape), const(layer["wih_b"].shape),
            const(layer["b_f"].shape), const(layer["b_b"].shape),
            const(layer["whh_bd"].shape),
        ],
        out_specs=pl.BlockSpec((T, bt, 2 * Hp), lambda b: (0, b, 0)),
        scratch_shapes=[
            pltpu.VMEM((CT, bt, 4 * Hp), jnp.float32),   # streamed x@W_ih (fwd chunk)
            pltpu.VMEM((CT, bt, 4 * Hp), jnp.float32),   # streamed x@W_ih (bwd chunk)
            pltpu.VMEM((bt, 2 * Hp), jnp.float32),       # [h_fwd | h_bwd]
            pltpu.VMEM((bt, 2 * Hp), jnp.float32),       # [c_fwd | c_bwd]
        ],
        compiler_params=pltpu.CompilerParams(
            dimension_semantics=("parallel",),
            vmem_limit_bytes=_vmem_limit(est)),
    )(x_p, layer["wih_f"], layer["wih_b"], layer["b_f"], layer["b_b"], layer["whh_bd"])


# ------------------------------------------------------------------
# Kernel 2: last LSTM layer + fused FC head.
# Forward: full recurrence, only the final h kept.  Backward: exactly one cell
# step on x[T-1] from zero state (== PyTorch output[:, -1, H:2H]).
# ------------------------------------------------------------------
def _bilstm_head_kernel(x_ref, wih_f_ref, whh_f_ref, b_f_ref, wih_b_ref, b_b_ref,
                        static_ref, w1f_ref, w1b_ref, w1s_ref, b1_ref, w2_ref, b2_ref,
                        o_ref, xg_f_sc, h_sc, c_sc, *, chunk_t):
    T, bt, Ip = x_ref.shape
    Hp = whh_f_ref.shape[0]
    CT = chunk_t
    ncc = T // CT

    h_sc[...] = jnp.zeros_like(h_sc)
    c_sc[...] = jnp.zeros_like(c_sc)

    # Forward recurrence over all T steps (chunked projection; no per-step HBM writes).
    @pl.loop(0, ncc)
    def _(c):
        f_start = pl.multiple_of(c * CT, CT)
        x_f = x_ref[pl.ds(f_start, CT)].reshape(CT * bt, Ip)
        xg_f_sc[...] = (jnp.dot(x_f, wih_f_ref[...], preferred_element_type=jnp.float32)
                        + b_f_ref[...]).reshape(CT, bt, 4 * Hp)

        @pl.loop(0, CT)
        def _(s):
            gates_f = xg_f_sc[s] + jnp.dot(h_sc[...], whh_f_ref[...],
                                           preferred_element_type=jnp.float32)
            h_f, c_f = _cell(gates_f, c_sc[...], Hp)
            h_sc[...] = h_f
            c_sc[...] = c_f

    # Backward direction at t = T-1: one step from zero state (h0 @ W_hh == 0).
    gates_b = (jnp.dot(x_ref[T - 1], wih_b_ref[...], preferred_element_type=jnp.float32)
               + b_b_ref[...])
    h_b, _ = _cell(gates_b, jnp.zeros((bt, Hp), jnp.float32), Hp)

    # Fused FC head: Linear -> ReLU -> (Dropout = identity at inference) -> Linear.
    h1 = (jnp.dot(h_sc[...], w1f_ref[...], preferred_element_type=jnp.float32)
          + jnp.dot(h_b, w1b_ref[...], preferred_element_type=jnp.float32)
          + jnp.dot(static_ref[...], w1s_ref[...], preferred_element_type=jnp.float32)
          + b1_ref[...])
    h1 = jnp.maximum(h1, 0.0)
    o_ref[...] = (jnp.dot(h1, w2_ref[...], preferred_element_type=jnp.float32)
                  + b2_ref[...]).astype(o_ref.dtype)


def _head_vmem_bytes(T, bt, Ip, Hp, CT, Sp, FC):
    blocks = T * bt * Ip + bt * Sp + bt * LANE
    weights = (2 * Ip * 4 * Hp + 2 * 4 * Hp + Hp * 4 * Hp
               + 2 * Hp * FC + Sp * FC + FC + FC * LANE + LANE)
    scratch = CT * bt * 4 * Hp + 2 * bt * Hp
    return (2 * (blocks + weights) + scratch) * 4


def bilstm_head_layer(x_p, last, fc, static_p, Hp):
    """x_p: (T, Bp, Ip) last-layer input; static_p: (Bp, Sp) -> padded logits (Bp, 128)."""
    T, Bp, Ip = x_p.shape
    Sp = static_p.shape[1]
    FC = fc["w1f"].shape[1]
    bt, CT = _choose_tiling(Bp, T, lambda b, c: _head_vmem_bytes(T, b, Ip, Hp, c, Sp, FC))
    est = _head_vmem_bytes(T, bt, Ip, Hp, CT, Sp, FC)
    kernel = functools.partial(_bilstm_head_kernel, chunk_t=CT)

    def const(shape):
        return pl.BlockSpec(shape, lambda b, _s=shape: tuple(0 for _ in _s))

    return pl.pallas_call(
        kernel,
        out_shape=jax.ShapeDtypeStruct((Bp, LANE), jnp.float32),
        grid=(Bp // bt,),
        in_specs=[
            pl.BlockSpec((T, bt, Ip), lambda b: (0, b, 0)),
            const(last["wih_f"].shape), const(last["whh_f"].shape), const(last["b_f"].shape),
            const(last["wih_b"].shape), const(last["b_b"].shape),
            pl.BlockSpec((bt, Sp), lambda b: (b, 0)),
            const(fc["w1f"].shape), const(fc["w1b"].shape), const(fc["w1s"].shape),
            const(fc["b1"].shape), const(fc["w2"].shape), const(fc["b2"].shape),
        ],
        out_specs=pl.BlockSpec((bt, LANE), lambda b: (b, 0)),
        scratch_shapes=[
            pltpu.VMEM((CT, bt, 4 * Hp), jnp.float32),   # streamed x@W_ih (fwd chunk)
            pltpu.VMEM((bt, Hp), jnp.float32),           # h_fwd
            pltpu.VMEM((bt, Hp), jnp.float32),           # c_fwd
        ],
        compiler_params=pltpu.CompilerParams(
            dimension_semantics=("parallel",),
            vmem_limit_bytes=_vmem_limit(est)),
    )(x_p, last["wih_f"], last["whh_f"], last["b_f"], last["wih_b"], last["b_b"],
      static_p, fc["w1f"], fc["w1b"], fc["w1s"], fc["b1"], fc["w2"], fc["b2"])


# ------------------------------------------------------------------
# Parameter construction (PyTorch-style) and lane/sublane padding ("packing")
# ------------------------------------------------------------------
def init_params(key, input_size, hidden_size, num_layers, n_static,
                fc_hidden=128, out_dim=1):
    H = hidden_size

    def uni(key, shape, bound):
        return jax.random.uniform(key, shape, jnp.float32, -bound, bound)

    k = 1.0 / (H ** 0.5)
    lstm_layers = []
    for layer in range(num_layers):
        in_sz = input_size if layer == 0 else 2 * H
        dirs = {}
        for d in ("fwd", "bwd"):
            key, k1, k2, k3, k4 = jax.random.split(key, 5)
            w_ih = uni(k1, (in_sz, 4 * H), k)
            w_hh = uni(k2, (H, 4 * H), k)
            b = uni(k3, (1, 4 * H), k) + uni(k4, (1, 4 * H), k)  # b_ih + b_hh
            dirs[d] = (w_ih, w_hh, b)
        lstm_layers.append(dirs)

    fc_in = 2 * H + n_static
    kf = 1.0 / (fc_in ** 0.5)
    kf2 = 1.0 / (fc_hidden ** 0.5)
    key, k1, k2, k3, k4 = jax.random.split(key, 5)
    w1 = uni(k1, (fc_in, fc_hidden), kf)
    b1 = uni(k2, (1, fc_hidden), kf)
    w2 = uni(k3, (fc_hidden, out_dim), kf2)
    b2 = uni(k4, (1, out_dim), kf2)
    return {"lstm": lstm_layers, "fc": (w1, b1, w2, b2)}


# Source gate order (PyTorch / reference) is (i, f, g, o); packed order is (i, f, o, g)
# so the three sigmoid gates are lane-contiguous inside the kernel.
_GATE_SRC = (0, 1, 3, 2)


def _pad_gates(w, H, Hp):
    """(rows, 4H) src-order -> (rows, 4Hp) packed-order, zero-padded gate columns."""
    rows = w.shape[0]
    out = jnp.zeros((rows, 4 * Hp), jnp.float32)
    for dst, src in enumerate(_GATE_SRC):
        out = out.at[:, dst * Hp:dst * Hp + H].set(w[:, src * H:(src + 1) * H])
    return out


def pack_params(params, input_size, hidden_size, n_static, fc_hidden=128):
    H = hidden_size
    Hp = _round_up(H, LANE)
    Ip = _round_up(input_size, LANE)
    Sp = _round_up(n_static, LANE)
    n_layers = len(params["lstm"])

    def pack_wih(w_ih, layer_idx):
        w_g = _pad_gates(w_ih, H, Hp)
        if layer_idx == 0:
            return jnp.zeros((Ip, 4 * Hp), jnp.float32).at[:input_size].set(w_g)
        # Layer input is [h_fwd (Hp lanes) ; h_bwd (Hp lanes)] of the previous layer.
        return (jnp.zeros((2 * Hp, 4 * Hp), jnp.float32)
                .at[0:H].set(w_g[0:H])
                .at[Hp:Hp + H].set(w_g[H:2 * H]))

    inner = []
    for li in range(n_layers - 1):
        layer = params["lstm"][li]
        whh_bd = jnp.zeros((2 * Hp, 8 * Hp), jnp.float32)
        whh_bd = whh_bd.at[0:H, 0:4 * Hp].set(_pad_gates(layer["fwd"][1], H, Hp))
        whh_bd = whh_bd.at[Hp:Hp + H, 4 * Hp:8 * Hp].set(_pad_gates(layer["bwd"][1], H, Hp))
        inner.append(dict(
            wih_f=pack_wih(layer["fwd"][0], li),
            wih_b=pack_wih(layer["bwd"][0], li),
            b_f=_pad_gates(layer["fwd"][2], H, Hp),
            b_b=_pad_gates(layer["bwd"][2], H, Hp),
            whh_bd=whh_bd))

    li = n_layers - 1
    layer = params["lstm"][li]
    whh_f = jnp.zeros((Hp, 4 * Hp), jnp.float32).at[0:H].set(
        _pad_gates(layer["fwd"][1], H, Hp))
    last = dict(
        wih_f=pack_wih(layer["fwd"][0], li),
        whh_f=whh_f,
        b_f=_pad_gates(layer["fwd"][2], H, Hp),
        wih_b=pack_wih(layer["bwd"][0], li),
        b_b=_pad_gates(layer["bwd"][2], H, Hp))

    w1, b1, w2, b2 = params["fc"]
    assert fc_hidden % LANE == 0, "FC hidden width assumed lane-aligned (128)"
    w1f = jnp.zeros((Hp, fc_hidden), jnp.float32).at[0:H].set(w1[0:H])
    w1b = jnp.zeros((Hp, fc_hidden), jnp.float32).at[0:H].set(w1[H:2 * H])
    w1s = jnp.zeros((Sp, fc_hidden), jnp.float32).at[0:n_static].set(w1[2 * H:])
    out_dim = w2.shape[1]
    w2_p = jnp.zeros((fc_hidden, LANE), jnp.float32).at[:, :out_dim].set(w2)
    b2_p = jnp.zeros((1, LANE), jnp.float32).at[:, :out_dim].set(b2)
    fc = dict(w1f=w1f, w1b=w1b, w1s=w1s, b1=b1, w2=w2_p, b2=b2_p)

    return {"inner": inner, "last": last, "fc": fc,
            "Hp": Hp, "Ip": Ip, "Sp": Sp, "H": H, "I": input_size,
            "S": n_static, "out_dim": out_dim}


# ------------------------------------------------------------------
# Model wrapper (glue in plain JAX)
# ------------------------------------------------------------------
def bilstm_classifier_forward(x_temp, x_static, packed):
    """x_temp: (B, T, I) float32, x_static: (B, S) float32 -> logits (B, out_dim)."""
    B, T, I = x_temp.shape
    Hp, Ip, Sp = packed["Hp"], packed["Ip"], packed["Sp"]
    Bp = _round_up(B, SUBLANE)

    # TODO(synk): layer-0 feature dim is still padded to a lane multiple in HBM; for very
    #             wide T / narrow I consider passing the true width (full-extent block).
    x = jnp.transpose(x_temp, (1, 0, 2))                    # time-major (T, B, I)
    x = jnp.pad(x, ((0, 0), (0, Bp - B), (0, Ip - I)))      # (T, Bp, Ip)

    for layer in packed["inner"]:
        x = bilstm_inner_layer(x, layer, Hp)
        # dropout between LSTM layers is identity at inference

    static_p = jnp.pad(x_static, ((0, Bp - B), (0, Sp - packed["S"])))
    out_p = bilstm_head_layer(x, packed["last"], packed["fc"], static_p, Hp)  # (Bp, 128)
    return out_p[:B, :packed["out_dim"]]


# ------------------------------------------------------------------
# Pure-JAX reference (unpadded) used for a correctness check in __main__
# ------------------------------------------------------------------
def _reference_forward(x_temp, x_static, params):
    hp = lax.Precision.HIGHEST
    x = jnp.transpose(x_temp, (1, 0, 2))
    B = x.shape[1]
    for layer in params["lstm"]:
        outs = []
        for d, seq in (("fwd", x), ("bwd", x[::-1])):
            w_ih, w_hh, b = layer[d]
            H = w_hh.shape[0]

            def step(carry, x_t, w_ih=w_ih, w_hh=w_hh, b=b, H=H):
                h, c = carry
                g = (jnp.dot(x_t, w_ih, precision=hp)
                     + jnp.dot(h, w_hh, precision=hp) + b)
                i = jax.nn.sigmoid(g[:, :H])
                f = jax.nn.sigmoid(g[:, H:2 * H])
                gg = jnp.tanh(g[:, 2 * H:3 * H])
                o = jax.nn.sigmoid(g[:, 3 * H:4 * H])
                c = f * c + i * gg
                h = o * jnp.tanh(c)
                return (h, c), h

            _, hs = lax.scan(step, (jnp.zeros((B, H), jnp.float32),
                                    jnp.zeros((B, H), jnp.float32)), seq)
            outs.append(hs if d == "fwd" else hs[::-1])
        x = jnp.concatenate(outs, axis=-1)
    lstm_out = x[-1]
    combined = jnp.concatenate([lstm_out, x_static], axis=1)
    w1, b1, w2, b2 = params["fc"]
    h = jnp.maximum(jnp.dot(combined, w1, precision=hp) + b1, 0.0)
    return jnp.dot(h, w2, precision=hp) + b2


if __name__ == "__main__":
    # Small deterministic example shapes
    B, T = 2, 8
    lstm_input_size = 16
    lstm_hidden_size = 32
    lstm_num_layers = 2
    n_static_feats = 4

    key = jax.random.PRNGKey(0)
    key, kx, ks, kp = jax.random.split(key, 4)
    x_temp = jax.random.normal(kx, (B, T, lstm_input_size), jnp.float32)
    x_static = jax.random.normal(ks, (B, n_static_feats), jnp.float32)

    params = init_params(kp, lstm_input_size, lstm_hidden_size,
                         lstm_num_layers, n_static_feats)
    packed = pack_params(params, lstm_input_size, lstm_hidden_size, n_static_feats)

    logits = bilstm_classifier_forward(x_temp, x_static, packed)
    logits = jax.block_until_ready(logits)

    assert logits.shape == (B, 1)
    assert bool(jnp.all(jnp.isfinite(logits)))

    ref = _reference_forward(x_temp, x_static, params)
    assert bool(jnp.allclose(logits, ref, atol=2e-3, rtol=2e-3)), (logits, ref)

    print("KERNEL_OK")
</pallas_src>

<mosaic_0001>
module attributes {stable_mosaic.version = 11 : i64} {
  func.func @_bilstm_inner_kernel(%arg0: i32, %arg1: memref<8x8x128xf32, #tpu.memory_space<vmem>>, %arg2: memref<128x512xf32, #tpu.memory_space<vmem>>, %arg3: memref<128x512xf32, #tpu.memory_space<vmem>>, %arg4: memref<1x512xf32, #tpu.memory_space<vmem>>, %arg5: memref<1x512xf32, #tpu.memory_space<vmem>>, %arg6: memref<256x1024xf32, #tpu.memory_space<vmem>>, %arg7: memref<8x8x256xf32, #tpu.memory_space<vmem>>, %arg8: memref<8x8x512xf32, #tpu.memory_space<vmem>>, %arg9: memref<8x8x512xf32, #tpu.memory_space<vmem>>, %arg10: memref<8x256xf32, #tpu.memory_space<vmem>>, %arg11: memref<8x256xf32, #tpu.memory_space<vmem>>) attributes {dimension_semantics = [#tpu.dimension_semantics<parallel>], iteration_bounds = array<i64: 1>, scalar_prefetch = 0 : i64, scratch_operands = 4 : i64, tpu.core_type = #tpu.core_type<tc>, window_params = [{transform_indices = @transform_0, window_bounds = array<i64: 8, 8, 128>}, {pipeline_mode = #tpu.pipeline_mode<synchronous>, transform_indices = @transform_1, window_bounds = array<i64: 128, 512>}, {pipeline_mode = #tpu.pipeline_mode<synchronous>, transform_indices = @transform_2, window_bounds = array<i64: 128, 512>}, {pipeline_mode = #tpu.pipeline_mode<synchronous>, transform_indices = @transform_3, window_bounds = array<i64: 1, 512>}, {pipeline_mode = #tpu.pipeline_mode<synchronous>, transform_indices = @transform_4, window_bounds = array<i64: 1, 512>}, {pipeline_mode = #tpu.pipeline_mode<synchronous>, transform_indices = @transform_5, window_bounds = array<i64: 256, 1024>}, {transform_indices = @transform_6, window_bounds = array<i64: 8, 8, 256>}]} {
    %cst = arith.constant 0.000000e+00 : f32
    %0 = vector.broadcast %cst : f32 to vector<8x256xf32>
    %c0 = arith.constant 0 : index
    %c0_0 = arith.constant 0 : index
    %1 = vector.load %arg10[%c0, %c0_0] : memref<8x256xf32, #tpu.memory_space<vmem>>, vector<8x256xf32>
    tpu.vector_store %arg10[%c0, %c0_0], %0 {strides = array<i32>} : memref<8x256xf32, #tpu.memory_space<vmem>>, vector<8x256xf32>,
    %cst_1 = arith.constant 0.000000e+00 : f32
    %2 = vector.broadcast %cst_1 : f32 to vector<8x256xf32>
    %c0_2 = arith.constant 0 : index
    %c0_3 = arith.constant 0 : index
    %3 = vector.load %arg11[%c0_2, %c0_3] : memref<8x256xf32, #tpu.memory_space<vmem>>, vector<8x256xf32>
    tpu.vector_store %arg11[%c0_2, %c0_3], %2 {strides = array<i32>} : memref<8x256xf32, #tpu.memory_space<vmem>>, vector<8x256xf32>,
    %c0_i32 = arith.constant 0 : i32
    %c1_i32 = arith.constant 1 : i32
    %4 = arith.muli %c0_i32, %c1_i32 : i32
    %c0_i32_4 = arith.constant 0 : i32
    %5 = arith.addi %c0_i32_4, %4 : i32
    %c8_i32 = arith.constant 8 : i32
    %6 = arith.muli %5, %c8_i32 : i32
    %7 = tpu.assume_multiple %6, 8 : i32
    %c0_i32_5 = arith.constant 0 : i32
    %8 = arith.subi %c0_i32_5, %5 : i32
    %c8_i32_6 = arith.constant 8 : i32
    %9 = arith.muli %8, %c8_i32_6 : i32
    %10 = tpu.assume_multiple %9, 8 : i32
    %11 = arith.index_cast %7 : i32 to index
    %c0_7 = arith.constant 0 : index
    %c0_8 = arith.constant 0 : index
    %12 = vector.load %arg1[%11, %c0_7, %c0_8] : memref<8x8x128xf32, #tpu.memory_space<vmem>>, vector<8x8x128xf32>
    %13 = vector.shape_cast %12 : vector<8x8x128xf32> to vector<64x128xf32>
    %14 = arith.index_cast %10 : i32 to index
    %c0_9 = arith.constant 0 : index
    %c0_10 = arith.constant 0 : index
    %15 = vector.load %arg1[%14, %c0_9, %c0_10] : memref<8x8x128xf32, #tpu.memory_space<vmem>>, vector<8x8x128xf32>
    %16 = vector.shape_cast %15 : vector<8x8x128xf32> to vector<64x128xf32>
    %c0_11 = arith.constant 0 : index
    %c0_12 = arith.constant 0 : index
    %17 = vector.load %arg2[%c0_11, %c0_12] : memref<128x512xf32, #tpu.memory_space<vmem>>, vector<128x512xf32>
    %cst_13 = arith.constant dense<0.000000e+00> : vector<64x512xf32>
    %18 = tpu.matmul %13, %17, %cst_13 {dimension_numbers = #tpu.dot_dimension_numbers<[1], [0], [0], [1], [0, 0, 1, 1], [], []>} : vector<64x128xf32>, vector<128x512xf32>, vector<64x512xf32> -> vector<64x512xf32>
    %c0_14 = arith.constant 0 : index
    %c0_15 = arith.constant 0 : index
    %19 = vector.load %arg4[%c0_14, %c0_15] : memref<1x512xf32, #tpu.memory_space<vmem>>, vector<1x512xf32>
    %20 = vector.broadcast %19 : vector<1x512xf32> to vector<64x512xf32>
    %21 = arith.addf %18, %20 : vector<64x512xf32>
    %22 = vector.shape_cast %21 : vector<64x512xf32> to vector<8x8x512xf32>
    %c0_16 = arith.constant 0 : index
    %c0_17 = arith.constant 0 : index
    %c0_18 = arith.constant 0 : index
    %23 = vector.load %arg8[%c0_16, %c0_17, %c0_18] : memref<8x8x512xf32, #tpu.memory_space<vmem>>, vector<8x8x512xf32>
    tpu.vector_store %arg8[%c0_16, %c0_17, %c0_18], %22 {strides = array<i32>} : memref<8x8x512xf32, #tpu.memory_space<vmem>>, vector<8x8x512xf32>,
    %c0_19 = arith.constant 0 : index
    %c0_20 = arith.constant 0 : index
    %24 = vector.load %arg3[%c0_19, %c0_20] : memref<128x512xf32, #tpu.memory_space<vmem>>, vector<128x512xf32>
    %cst_21 = arith.constant dense<0.000000e+00> : vector<64x512xf32>
    %25 = tpu.matmul %16, %24, %cst_21 {dimension_numbers = #tpu.dot_dimension_numbers<[1], [0], [0], [1], [0, 0, 1, 1], [], []>} : vector<64x128xf32>, vector<128x512xf32>, vector<64x512xf32> -> vector<64x512xf32>
    %c0_22 = arith.constant 0 : index
    %c0_23 = arith.constant 0 : index
    %26 = vector.load %arg5[%c0_22, %c0_23] : memref<1x512xf32, #tpu.memory_space<vmem>>, vector<1x512xf32>
    %27 = vector.broadcast %26 : vector<1x512xf32> to vector<64x512xf32>
    %28 = arith.addf %25, %27 : vector<64x512xf32>
    %29 = vector.shape_cast %28 : vector<64x512xf32> to vector<8x8x512xf32>
    %c0_24 = arith.constant 0 : index
    %c0_25 = arith.constant 0 : index
    %c0_26 = arith.constant 0 : index
    %30 = vector.load %arg9[%c0_24, %c0_25, %c0_26] : memref<8x8x512xf32, #tpu.memory_space<vmem>>, vector<8x8x512xf32>
    tpu.vector_store %arg9[%c0_24, %c0_25, %c0_26], %29 {strides = array<i32>} : memref<8x8x512xf32, #tpu.memory_space<vmem>>, vector<8x8x512xf32>,
    %c0_i32_27 = arith.constant 0 : i32
    %c8_i32_28 = arith.constant 8 : i32
    %31 = arith.addi %c0_i32_27, %c8_i32_28 : i32
    %c1_i32_29 = arith.constant 1 : i32
    scf.for %arg12 = %c0_i32_27 to %31 step %c1_i32_29  : i32 {
      %c1_i32_32 = arith.constant 1 : i32
      %32 = arith.muli %arg12, %c1_i32_32 : i32
      %c0_i32_33 = arith.constant 0 : i32
      %33 = arith.addi %c0_i32_33, %32 : i32
      %34 = arith.addi %7, %33 : i32
      %c7_i32 = arith.constant 7 : i32
      %35 = arith.subi %c7_i32, %34 : i32
      %c0_34 = arith.constant 0 : index
      %c0_35 = arith.constant 0 : index
      %36 = vector.load %arg10[%c0_34, %c0_35] : memref<8x256xf32, #tpu.memory_space<vmem>>, vector<8x256xf32>
      %c0_36 = arith.constant 0 : index
      %c0_37 = arith.constant 0 : index
      %37 = vector.load %arg6[%c0_36, %c0_37] : memref<256x1024xf32, #tpu.memory_space<vmem>>, vector<256x1024xf32>
      %cst_38 = arith.constant dense<0.000000e+00> : vector<8x1024xf32>
      %38 = tpu.matmul %36, %37, %cst_38 {dimension_numbers = #tpu.dot_dimension_numbers<[1], [0], [0], [1], [0, 0, 1, 1], [], []>} : vector<8x256xf32>, vector<256x1024xf32>, vector<8x1024xf32> -> vector<8x1024xf32>
      %39 = vector.extract_strided_slice %38 {offsets = [0, 0], sizes = [8, 512], strides = [1, 1]} : vector<8x1024xf32> to vector<8x512xf32>
      %40 = arith.index_cast %33 : i32 to index
      %c0_39 = arith.constant 0 : index
      %c0_40 = arith.constant 0 : index
      %41 = vector.load %arg8[%40, %c0_39, %c0_40] : memref<8x8x512xf32, #tpu.memory_space<vmem>>, vector<1x8x512xf32>
      %42 = vector.shape_cast %41 : vector<1x8x512xf32> to vector<8x512xf32>
      %43 = arith.addf %39, %42 : vector<8x512xf32>
      %44 = vector.extract_strided_slice %38 {offsets = [0, 512], sizes = [8, 512], strides = [1, 1]} : vector<8x1024xf32> to vector<8x512xf32>
      %c7_i32_41 = arith.constant 7 : i32
      %45 = arith.subi %c7_i32_41, %33 : i32
      %46 = arith.index_cast %45 : i32 to index
      %c0_42 = arith.constant 0 : index
      %c0_43 = arith.constant 0 : index
      %47 = vector.load %arg9[%46, %c0_42, %c0_43] : memref<8x8x512xf32, #tpu.memory_space<vmem>>, vector<1x8x512xf32>
      %48 = vector.shape_cast %47 : vector<1x8x512xf32> to vector<8x512xf32>
      %49 = arith.addf %44, %48 : vector<8x512xf32>
      %c0_44 = arith.constant 0 : index
      %c0_45 = arith.constant 0 : index
      %50 = vector.load %arg11[%c0_44, %c0_45] : memref<8x256xf32, #tpu.memory_space<vmem>>, vector<8x256xf32>
      %51 = vector.extract_strided_slice %50 {offsets = [0, 0], sizes = [8, 128], strides = [1, 1]} : vector<8x256xf32> to vector<8x128xf32>
      %52 = vector.extract_strided_slice %43 {offsets = [0, 0], sizes = [8, 384], strides = [1, 1]} : vector<8x512xf32> to vector<8x384xf32>
      %53 = arith.negf %52 : vector<8x384xf32>
      %54 = math.exp %53 : vector<8x384xf32>
      %cst_46 = arith.constant 1.000000e+00 : f32
      %55 = vector.broadcast %cst_46 : f32 to vector<8x384xf32>
      %56 = arith.addf %55, %54 : vector<8x384xf32>
      %57 = arith.divf %55, %56 : vector<8x384xf32>
      %58 = vector.extract_strided_slice %43 {offsets = [0, 384], sizes = [8, 128], strides = [1, 1]} : vector<8x512xf32> to vector<8x128xf32>
      %59 = math.tanh %58 : vector<8x128xf32>
      %60 = vector.extract_strided_slice %57 {offsets = [0, 0], sizes = [8, 128], strides = [1, 1]} : vector<8x384xf32> to vector<8x128xf32>
      %61 = vector.extract_strided_slice %57 {offsets = [0, 128], sizes = [8, 128], strides = [1, 1]} : vector<8x384xf32> to vector<8x128xf32>
      %62 = vector.extract_strided_slice %57 {offsets = [0, 256], sizes = [8, 128], strides = [1, 1]} : vector<8x384xf32> to vector<8x128xf32>
      %63 = arith.mulf %61, %51 : vector<8x128xf32>
      %64 = arith.mulf %60, %59 : vector<8x128xf32>
      %65 = arith.addf %63, %64 : vector<8x128xf32>
      %66 = math.tanh %65 : vector<8x128xf32>
      %67 = arith.mulf %62, %66 : vector<8x128xf32>
      %68 = vector.extract_strided_slice %50 {offsets = [0, 128], sizes = [8, 128], strides = [1, 1]} : vector<8x256xf32> to vector<8x128xf32>
      %69 = vector.extract_strided_slice %49 {offsets = [0, 0], sizes = [8, 384], strides = [1, 1]} : vector<8x512xf32> to vector<8x384xf32>
      %70 = arith.negf %69 : vector<8x384xf32>
      %71 = math.exp %70 : vector<8x384xf32>
      %cst_47 = arith.constant 1.000000e+00 : f32
      %72 = vector.broadcast %cst_47 : f32 to vector<8x384xf32>
      %73 = arith.addf %72, %71 : vector<8x384xf32>
      %74 = arith.divf %72, %73 : vector<8x384xf32>
      %75 = vector.extract_strided_slice %49 {offsets = [0, 384], sizes = [8, 128], strides = [1, 1]} : vector<8x512xf32> to vector<8x128xf32>
      %76 = math.tanh %75 : vector<8x128xf32>
      %77 = vector.extract_strided_slice %74 {offsets = [0, 0], sizes = [8, 128], strides = [1, 1]} : vector<8x384xf32> to vector<8x128xf32>
      %78 = vector.extract_strided_slice %74 {offsets = [0, 128], sizes = [8, 128], strides = [1, 1]} : vector<8x384xf32> to vector<8x128xf32>
      %79 = vector.extract_strided_slice %74 {offsets = [0, 256], sizes = [8, 128], strides = [1, 1]} : vector<8x384xf32> to vector<8x128xf32>
      %80 = arith.mulf %78, %68 : vector<8x128xf32>
      %81 = arith.mulf %77, %76 : vector<8x128xf32>
      %82 = arith.addf %80, %81 : vector<8x128xf32>
      %83 = math.tanh %82 : vector<8x128xf32>
      %84 = arith.mulf %79, %83 : vector<8x128xf32>
      %85 = tpu.concatenate %67, %84 in 1 : vector<8x128xf32>, vector<8x128xf32> -> vector<8x256xf32>
      %c0_48 = arith.constant 0 : index
      %c0_49 = arith.constant 0 : index
      %86 = vector.load %arg10[%c0_48, %c0_49] : memref<8x256xf32, #tpu.memory_space<vmem>>, vector<8x256xf32>
      tpu.vector_store %arg10[%c0_48, %c0_49], %85 {strides = array<i32>} : memref<8x256xf32, #tpu.memory_space<vmem>>, vector<8x256xf32>,
      %87 = tpu.concatenate %65, %82 in 1 : vector<8x128xf32>, vector<8x128xf32> -> vector<8x256xf32>
      %c0_50 = arith.constant 0 : index
      %c0_51 = arith.constant 0 : index
      %88 = vector.load %arg11[%c0_50, %c0_51] : memref<8x256xf32, #tpu.memory_space<vmem>>, vector<8x256xf32>
      tpu.vector_store %arg11[%c0_50, %c0_51], %87 {strides = array<i32>} : memref<8x256xf32, #tpu.memory_space<vmem>>, vector<8x256xf32>,
      %89 = arith.index_cast %34 : i32 to index
      %c0_52 = arith.constant 0 : index
      %c0_53 = arith.constant 0 : index
      %90 = vector.load %arg7[%89, %c0_52, %c0_53] : memref<8x8x256xf32, #tpu.memory_space<vmem>>, vector<1x8x128xf32>
      %91 = vector.shape_cast %90 : vector<1x8x128xf32> to vector<8x128xf32>
      %92 = vector.shape_cast %67 : vector<8x128xf32> to vector<1x8x128xf32>
      tpu.vector_store %arg7[%89, %c0_52, %c0_53], %92 {strides = array<i32>} : memref<8x8x256xf32, #tpu.memory_space<vmem>>, vector<1x8x128xf32>,
      %93 = arith.index_cast %35 : i32 to index
      %c0_54 = arith.constant 0 : index
      %c128 = arith.constant 128 : index
      %94 = vector.load %arg7[%93, %c0_54, %c128] : memref<8x8x256xf32, #tpu.memory_space<vmem>>, vector<1x8x128xf32>
      %95 = vector.shape_cast %94 : vector<1x8x128xf32> to vector<8x128xf32>
      %96 = vector.shape_cast %84 : vector<8x128xf32> to vector<1x8x128xf32>
      tpu.vector_store %arg7[%93, %c0_54, %c128], %96 {strides = array<i32>} : memref<8x8x256xf32, #tpu.memory_space<vmem>>, vector<1x8x128xf32>,
    }
    %c8_i32_30 = arith.constant 8 : i32
    %c1_i32_31 = arith.constant 1 : i32
    return
  }
  func.func @transform_0(%arg0: i32) -> (i32, i32, i32) {
    %c0_i32 = arith.constant 0 : i32
    %c0_i32_0 = arith.constant 0 : i32
    %c0_i32_1 = arith.constant 0 : i32
    return %c0_i32, %arg0, %c0_i32_0 : i32, i32, i32
  }
  func.func @transform_1(%arg0: i32) -> (i32, i32) {
    %c0_i32 = arith.constant 0 : i32
    %c0_i32_0 = arith.constant 0 : i32
    %c0_i32_1 = arith.constant 0 : i32
    return %c0_i32, %c0_i32_0 : i32, i32
  }
  func.func @transform_2(%arg0: i32) -> (i32, i32) {
    %c0_i32 = arith.constant 0 : i32
    %c0_i32_0 = arith.constant 0 : i32
    %c0_i32_1 = arith.constant 0 : i32
    return %c0_i32, %c0_i32_0 : i32, i32
  }
  func.func @transform_3(%arg0: i32) -> (i32, i32) {
    %c0_i32 = arith.constant 0 : i32
    %c0_i32_0 = arith.constant 0 : i32
    %c0_i32_1 = arith.constant 0 : i32
    return %c0_i32, %c0_i32_0 : i32, i32
  }
  func.func @transform_4(%arg0: i32) -> (i32, i32) {
    %c0_i32 = arith.constant 0 : i32
    %c0_i32_0 = arith.constant 0 : i32
    %c0_i32_1 = arith.constant 0 : i32
    return %c0_i32, %c0_i32_0 : i32, i32
  }
  func.func @transform_5(%arg0: i32) -> (i32, i32) {
    %c0_i32 = arith.constant 0 : i32
    %c0_i32_0 = arith.constant 0 : i32
    %c0_i32_1 = arith.constant 0 : i32
    return %c0_i32, %c0_i32_0 : i32, i32
  }
  func.func @transform_6(%arg0: i32) -> (i32, i32, i32) {
    %c0_i32 = arith.constant 0 : i32
    %c0_i32_0 = arith.constant 0 : i32
    %c0_i32_1 = arith.constant 0 : i32
    return %c0_i32, %arg0, %c0_i32_0 : i32, i32, i32
  }
}

</mosaic_0001>

<bundles_post_ra>
// kernel: tpu_custom_call.1
= control target key start
LH: loop header
LB: loop body
LE: loop exit
PB: predicated region body
PF: predicated region fallthrough
CT: control target
= control target key end

     0   :  { %11 = vsyncpa [#allocation7], 0  ;;  %s1974_s0 = inlined_call_operand.hbm [shape: f32[8,8,128], index: 0, kind: input, shape index: {}]   ;;  %s1975_s1 = inlined_call_operand.hbm [shape: f32[128,512], index: 1, kind: input, shape index: {}]   ;;  %s1976_s2 = inlined_call_operand.hbm [shape: f32[128,512], index: 2, kind: input, shape index: {}]   ;;  %s1977_s3 = inlined_call_operand.hbm [shape: f32[1,512], index: 3, kind: input, shape index: {}]   ;;  %s1978_s4 = inlined_call_operand.hbm [shape: f32[1,512], index: 4, kind: input, shape index: {}]   ;;  %s1979_s5 = inlined_call_operand.hbm [shape: f32[256,1024], index: 5, kind: input, shape index: {}]   ;;  %s1980_s6 = inlined_call_operand.hbm [shape: f32[8,8,256], index: 6, kind: output, shape index: {}]  }
   0x1   :  { %12 = vsyncpa [#allocation10], 0 }
   0x2   :  { %13 = vsyncpa [#allocation13], 0 }
   0x3   :  { %14 = vsyncpa [#allocation16], 0  ;;  %s33_s23 = sshll.u32 %s1975_s1, 4  ;;  %s34_s23 = int_to_ptr.hbm [resolvable:$true] %s33_s23 }
   0x4   :  { %15 = vsyncpa [#allocation8], 0  ;;  %s1712_s24 = smov [#allocation9]   ;;  %s60_s28 = sshll.u32 %s1977_s3, 4  ;;  %s61_s28 = int_to_ptr.hbm [resolvable:$true] %s60_s28 }
   0x5   :  { %s35_s25 = sshll.u32 %s1712_s24, 4  ;;  %s1713_s29 = smov 512   ;;  %s36_s25 = int_to_ptr.vmem [resolvable:$true] %s35_s25 }
   0x6   :  { %s1714_s30 = smov 32   ;;  %s1715_s7 = smov [#allocation12]  }
   0x7   :  { %41 = dma.hbm_to_vmem [thread:$0]  %s34_s23, 8192, %s36_s25, [#allocation10], %s1713_s29, %s1713_s29, %s1714_s30  }
   0x8   :  { %s62_s8 = sshll.u32 %s1715_s7, 4  ;;  %s20_s11 = sshll.u32 %s1974_s0, 4  ;;  %s63_s8 = int_to_ptr.vmem [resolvable:$true] %s62_s8  ;;  %s21_s11 = int_to_ptr.hbm [resolvable:$true] %s20_s11 }
   0x9   :  { %65 = dma.hbm_to_vmem [thread:$0]  %s61_s28, 64, %s63_s8, [#allocation13]  }
   0xa   :  { %s1716_s1 = smov [#allocation6]   ;;  %s46_s3 = sshll.u32 %s1976_s2, 4  ;;  %s47_s3 = int_to_ptr.hbm [resolvable:$true] %s46_s3 }
   0xb   :  { %s22_s12 = sshll.u32 %s1716_s1, 4  ;;  %s1717_s15 = smov 128   ;;  %s23_s12 = int_to_ptr.vmem [resolvable:$true] %s22_s12 }
   0xc   :  { %s1718_s16 = smov 8   ;;  %s1719_s17 = smov [#allocation11]  }
   0xd   :  { %28 = dma.hbm_to_vmem [thread:$0]  %s21_s11, 1024, %s23_s12, [#allocation7], %s1717_s15, %s1717_s15, %s1718_s16  }
   0xe   :  { %s48_s18 = sshll.u32 %s1719_s17, 4  ;;  %s71_s0 = sshll.u32 %s1978_s4, 4  ;;  %s49_s18 = int_to_ptr.vmem [resolvable:$true] %s48_s18  ;;  %s72_s0 = int_to_ptr.hbm [resolvable:$true] %s71_s0 }
   0xf   :  { %54 = dma.hbm_to_vmem [thread:$0]  %s47_s3, 8192, %s49_s18, [#allocation10], %s1713_s29, %s1713_s29, %s1714_s30  }
  0x10   :  { %s81_s23 = sshll.u32 %s1979_s5, 4  ;;  %s1720_s24 = smov [#allocation14]   ;;  %s82_s23 = int_to_ptr.hbm [resolvable:$true] %s81_s23 }
  0x11   :  { %s73_s25 = sshll.u32 %s1720_s24, 4  ;;  %s1721_s2 = smov [#allocation15]   ;;  %s74_s25 = int_to_ptr.vmem [resolvable:$true] %s73_s25 }
  0x12   :  { %76 = dma.hbm_to_vmem [thread:$0]  %s72_s0, 64, %s74_s25, [#allocation13]  }
  0x13   :  { %s83_s26 = sshll.u32 %s1721_s2, 4  ;;  %s1722_s27 = smov 1024   ;;  %s84_s26 = int_to_ptr.vmem [resolvable:$true] %s83_s26 }
  0x14   :  { %s1723_s28 = smov 64  }
  0x15   :  { %89 = dma.hbm_to_vmem [thread:$0]  %s82_s23, 32768, %s84_s26, [#allocation16], %s1722_s27, %s1722_s27, %s1723_s28  }
  0x16   :  { %1698 = dma.done.wait [#allocation7], 1024  }
  0x17   :  { %1699 = vsyncadd [#allocation7], 4294966272 }
  0x18   :  { %1700 = dma.done.wait [#allocation10], 16384  }
  0x19   :  { %1701 = vsyncadd [#allocation10], 4294950912 }
  0x1a   :  { %1702 = dma.done.wait [#allocation13], 128  }
  0x1b   :  { %1703 = vsyncadd [#allocation13], 4294967168 }
  0x1c   :  { %1704 = dma.done.wait [#allocation16], 32768  }
  0x1d   :  { %1705 = vsyncadd [#allocation16], 4294934528  ;;  %v1724_v0 = vmov 0.0   ;;  %v190_v1 = vld [vmem:[#allocation9 + $0x1f0] sm:$0xff]  ;;  %v191_v2 = vld [vmem:[#allocation9 + $0x1f8] sm:$0xff]  ;;  %s1911_s4 = smov 0  }
  0x1e   :  { %114 = vst [vmem:[#allocation4] sm:$0xff] %v1724_v0  ;;  %v186_v3 = vld [vmem:[#allocation9 + $0x1d0] sm:$0xff]  ;;  %284 = vmatpush.msra.mxu2 %v190_v1  ;;  %325 = vmatpush.msra.mxu3 %v191_v2  ;;  %v187_v4 = vld [vmem:[#allocation9 + $0x1d8] sm:$0xff]  ;;  %v188_v7 = vld [vmem:[#allocation9 + $0x1e0] sm:$0xff] }
  0x1f   :  { %115 = vst [vmem:[#allocation4 + $0x8] sm:$0xff] %v1724_v0  ;;  %v182_v5 = vld [vmem:[#allocation9 + $0x1b0] sm:$0xff]  ;;  %v183_v6 = vld [vmem:[#allocation9 + $0x1b8] sm:$0xff]  ;;  %v189_v8 = vld [vmem:[#allocation9 + $0x1e8] sm:$0xff]  ;;  %202 = vmatpush.msra.mxu0 %v188_v7 }
  0x20   :  { %116 = vst [vmem:[#allocation5 + $0x8] sm:$0xff] %v1724_v0  ;;  %285 = vmatpush.msra.mxu2 %v186_v3  ;;  %326 = vmatpush.msra.mxu3 %v187_v4  ;;  %v184_v9 = vld [vmem:[#allocation9 + $0x1c0] sm:$0xff]  ;;  %v185_v10 = vld [vmem:[#allocation9 + $0x1c8] sm:$0xff]  ;;  %v178_v11 = vld [vmem:[#allocation9 + $0x190] sm:$0xff] }
  0x21   :  { %117 = vst [vmem:[#allocation5] sm:$0xff] %v1724_v0  ;;  %243 = vmatpush.msra.mxu1 %v189_v8  ;;  %v179_v12 = vld [vmem:[#allocation9 + $0x198] sm:$0xff]  ;;  %v180_v13 = vld [vmem:[#allocation9 + $0x1a0] sm:$0xff]  ;;  %v181_v14 = vld [vmem:[#allocation9 + $0x1a8] sm:$0xff]  ;;  %203 = vmatpush.msra.mxu0 %v184_v9 }
  0x22   :  { %286 = vmatpush.msra.mxu2 %v182_v5  ;;  %327 = vmatpush.msra.mxu3 %v183_v6  ;;  %v174_v15 = vld [vmem:[#allocation9 + $0x170] sm:$0xff]  ;;  %v175_v16 = vld [vmem:[#allocation9 + $0x178] sm:$0xff]  ;;  %v176_v17 = vld [vmem:[#allocation9 + $0x180] sm:$0xff] }
  0x23   :  { %244 = vmatpush.msra.mxu1 %v185_v10  ;;  %v177_v18 = vld [vmem:[#allocation9 + $0x188] sm:$0xff]  ;;  %204 = vmatpush.msra.mxu0 %v180_v13  ;;  %v170_v19 = vld [vmem:[#allocation9 + $0x150] sm:$0xff]  ;;  %v171_v20 = vld [vmem:[#allocation9 + $0x158] sm:$0xff] }
  0x24   :  { %287 = vmatpush.msra.mxu2 %v178_v11  ;;  %328 = vmatpush.msra.mxu3 %v179_v12  ;;  %v172_v21 = vld [vmem:[#allocation9 + $0x160] sm:$0xff]  ;;  %v173_v22 = vld [vmem:[#allocation9 + $0x168] sm:$0xff]  ;;  %v166_v23 = vld [vmem:[#allocation9 + $0x130] sm:$0xff] }
  0x25   :  { %245 = vmatpush.msra.mxu1 %v181_v14  ;;  %205 = vmatpush.msra.mxu0 %v176_v17  ;;  %v167_v24 = vld [vmem:[#allocation9 + $0x138] sm:$0xff]  ;;  %v168_v25 = vld [vmem:[#allocation9 + $0x140] sm:$0xff]  ;;  %v169_v26 = vld [vmem:[#allocation9 + $0x148] sm:$0xff] }
  0x26   :  { %288 = vmatpush.msra.mxu2 %v174_v15  ;;  %329 = vmatpush.msra.mxu3 %v175_v16  ;;  %v162_v27 = vld [vmem:[#allocation9 + $0x110] sm:$0xff]  ;;  %v163_v28 = vld [vmem:[#allocation9 + $0x118] sm:$0xff]  ;;  %v164_v29 = vld [vmem:[#allocation9 + $0x120] sm:$0xff] }
  0x27   :  { %246 = vmatpush.msra.mxu1 %v177_v18  ;;  %206 = vmatpush.msra.mxu0 %v172_v21  ;;  %v165_v30 = vld [vmem:[#allocation9 + $0x128] sm:$0xff]  ;;  %v158_v31 = vld [vmem:[#allocation9 + $0xf0] sm:$0xff]  ;;  %v159_v32 = vld [vmem:[#allocation9 + $0xf8] sm:$0xff] }
  0x28   :  { %289 = vmatpush.msra.mxu2 %v170_v19  ;;  %330 = vmatpush.msra.mxu3 %v171_v20  ;;  %v160_v33 = vld [vmem:[#allocation9 + $0x100] sm:$0xff]  ;;  %v161_v34 = vld [vmem:[#allocation9 + $0x108] sm:$0xff]  ;;  %v154_v35 = vld [vmem:[#allocation9 + $0xd0] sm:$0xff] }
  0x29   :  { %247 = vmatpush.msra.mxu1 %v173_v22  ;;  %207 = vmatpush.msra.mxu0 %v168_v25  ;;  %v155_v36 = vld [vmem:[#allocation9 + $0xd8] sm:$0xff]  ;;  %v156_v37 = vld [vmem:[#allocation9 + $0xe0] sm:$0xff]  ;;  %v157_v38 = vld [vmem:[#allocation9 + $0xe8] sm:$0xff] }
  0x2a   :  { %290 = vmatpush.msra.mxu2 %v166_v23  ;;  %331 = vmatpush.msra.mxu3 %v167_v24  ;;  %v150_v39 = vld [vmem:[#allocation9 + $0xb0] sm:$0xff]  ;;  %v151_v40 = vld [vmem:[#allocation9 + $0xb8] sm:$0xff]  ;;  %v152_v41 = vld [vmem:[#allocation9 + $0xc0] sm:$0xff] }
  0x2b   :  { %248 = vmatpush.msra.mxu1 %v169_v26  ;;  %208 = vmatpush.msra.mxu0 %v164_v29  ;;  %v153_v42 = vld [vmem:[#allocation9 + $0xc8] sm:$0xff]  ;;  %v146_v43 = vld [vmem:[#allocation9 + $0x90] sm:$0xff]  ;;  %v147_v44 = vld [vmem:[#allocation9 + $0x98] sm:$0xff] }
  0x2c   :  { %291 = vmatpush.msra.mxu2 %v162_v27  ;;  %332 = vmatpush.msra.mxu3 %v163_v28  ;;  %v148_v45 = vld [vmem:[#allocation9 + $0xa0] sm:$0xff]  ;;  %v149_v46 = vld [vmem:[#allocation9 + $0xa8] sm:$0xff]  ;;  %v142_v47 = vld [vmem:[#allocation9 + $0x70] sm:$0xff] }
  0x2d   :  { %249 = vmatpush.msra.mxu1 %v165_v30  ;;  %209 = vmatpush.msra.mxu0 %v160_v33  ;;  %v143_v48 = vld [vmem:[#allocation9 + $0x78] sm:$0xff]  ;;  %v144_v49 = vld [vmem:[#allocation9 + $0x80] sm:$0xff]  ;;  %v145_v50 = vld [vmem:[#allocation9 + $0x88] sm:$0xff] }
  0x2e   :  { %292 = vmatpush.msra.mxu2 %v158_v31  ;;  %333 = vmatpush.msra.mxu3 %v159_v32  ;;  %v138_v51 = vld [vmem:[#allocation9 + $0x50] sm:$0xff]  ;;  %v139_v52 = vld [vmem:[#allocation9 + $0x58] sm:$0xff]  ;;  %v140_v53 = vld [vmem:[#allocation9 + $0x60] sm:$0xff] }
  0x2f   :  { %250 = vmatpush.msra.mxu1 %v161_v34  ;;  %210 = vmatpush.msra.mxu0 %v156_v37  ;;  %v141_v54 = vld [vmem:[#allocation9 + $0x68] sm:$0xff]  ;;  %v134_v55 = vld [vmem:[#allocation9 + $0x30] sm:$0xff]  ;;  %v135_v56 = vld [vmem:[#allocation9 + $0x38] sm:$0xff] }
  0x30   :  { %293 = vmatpush.msra.mxu2 %v154_v35  ;;  %334 = vmatpush.msra.mxu3 %v155_v36  ;;  %v136_v57 = vld [vmem:[#allocation9 + $0x40] sm:$0xff]  ;;  %v137_v58 = vld [vmem:[#allocation9 + $0x48] sm:$0xff]  ;;  %v130_v59 = vld [vmem:[#allocation9 + $0x10] sm:$0xff] }
  0x31   :  { %251 = vmatpush.msra.mxu1 %v157_v38  ;;  %211 = vmatpush.msra.mxu0 %v152_v41  ;;  %v131_v60 = vld [vmem:[#allocation9 + $0x18] sm:$0xff]  ;;  %v1781_v61 = vld [vmem:[#allocation6] sm:$0xff]  ;;  %v460_v62 = vld [vmem:[#allocation11 + $0x1f0] sm:$0xff] }
  0x32   :  { %294 = vmatpush.msra.mxu2 %v150_v39  ;;  %335 = vmatpush.msra.mxu3 %v151_v40  ;;  %v461_v63 = vld [vmem:[#allocation11 + $0x1f8] sm:$0xff]  ;;  %v132_v0 = vld [vmem:[#allocation9 + $0x20] sm:$0xff]  ;;  %v133_v1 = vld [vmem:[#allocation9 + $0x28] sm:$0xff] }
  0x33   :  { %252 = vmatpush.msra.mxu1 %v153_v42  ;;  %212 = vmatpush.msra.mxu0 %v148_v45  ;;  %v456_v2 = vld [vmem:[#allocation11 + $0x1d0] sm:$0xff]  ;;  %v457_v3 = vld [vmem:[#allocation11 + $0x1d8] sm:$0xff]  ;;  %v128_v4 = vld [vmem:[#allocation9] sm:$0xff] }
  0x34   :  { %295 = vmatpush.msra.mxu2 %v146_v43  ;;  %336 = vmatpush.msra.mxu3 %v147_v44  ;;  %v129_v5 = vld [vmem:[#allocation9 + $0x8] sm:$0xff]  ;;  %v458_v6 = vld [vmem:[#allocation11 + $0x1e0] sm:$0xff]  ;;  %v452_v8 = vld [vmem:[#allocation11 + $0x1b0] sm:$0xff] }
  0x35   :  { %253 = vmatpush.msra.mxu1 %v149_v46  ;;  %213 = vmatpush.msra.mxu0 %v144_v49  ;;  %v459_v7 = vld [vmem:[#allocation11 + $0x1e8] sm:$0xff]  ;;  %v453_v9 = vld [vmem:[#allocation11 + $0x1b8] sm:$0xff]  ;;  %v454_v11 = vld [vmem:[#allocation11 + $0x1c0] sm:$0xff] }
  0x36   :  { %296 = vmatpush.msra.mxu2 %v142_v47  ;;  %337 = vmatpush.msra.mxu3 %v143_v48  ;;  %v1787_v10 = vld [vmem:[#allocation6 + $0x8] sm:$0xff]  ;;  %v448_v13 = vld [vmem:[#allocation11 + $0x190] sm:$0xff]  ;;  %v449_v14 = vld [vmem:[#allocation11 + $0x198] sm:$0xff] }
  0x37   :  { %254 = vmatpush.msra.mxu1 %v145_v50  ;;  %214 = vmatpush.msra.mxu0 %v140_v53  ;;  %v455_v12 = vld [vmem:[#allocation11 + $0x1c8] sm:$0xff]  ;;  %v450_v15 = vld [vmem:[#allocation11 + $0x1a0] sm:$0xff]  ;;  %v444_v17 = vld [vmem:[#allocation11 + $0x170] sm:$0xff] }
  0x38   :  { %297 = vmatpush.msra.mxu2 %v138_v51  ;;  %338 = vmatpush.msra.mxu3 %v139_v52  ;;  %v451_v16 = vld [vmem:[#allocation11 + $0x1a8] sm:$0xff]  ;;  %v445_v18 = vld [vmem:[#allocation11 + $0x178] sm:$0xff]  ;;  %v446_v19 = vld [vmem:[#allocation11 + $0x180] sm:$0xff] }
  0x39   :  { %255 = vmatpush.msra.mxu1 %v141_v54  ;;  %215 = vmatpush.msra.mxu0 %v136_v57  ;;  %v447_v20 = vld [vmem:[#allocation11 + $0x188] sm:$0xff]  ;;  %v440_v21 = vld [vmem:[#allocation11 + $0x150] sm:$0xff]  ;;  %v441_v22 = vld [vmem:[#allocation11 + $0x158] sm:$0xff] }
  0x3a   :  { %298 = vmatpush.msra.mxu2 %v134_v55  ;;  %339 = vmatpush.msra.mxu3 %v135_v56  ;;  %v1793_v23 = vld [vmem:[#allocation6 + $0x10] sm:$0xff]  ;;  %v442_v24 = vld [vmem:[#allocation11 + $0x160] sm:$0xff]  ;;  %v443_v25 = vld [vmem:[#allocation11 + $0x168] sm:$0xff] }
  0x3b   :  { %256 = vmatpush.msra.mxu1 %v137_v58  ;;  %216 = vmatpush.msra.mxu0 %v132_v0  ;;  %v436_v26 = vld [vmem:[#allocation11 + $0x130] sm:$0xff]  ;;  %v437_v27 = vld [vmem:[#allocation11 + $0x138] sm:$0xff]  ;;  %v438_v28 = vld [vmem:[#allocation11 + $0x140] sm:$0xff] }
  0x3c   :  { %299 = vmatpush.msra.mxu2 %v130_v59  ;;  %340 = vmatpush.msra.mxu3 %v131_v60  ;;  %v439_v29 = vld [vmem:[#allocation11 + $0x148] sm:$0xff]  ;;  %v432_v30 = vld [vmem:[#allocation11 + $0x110] sm:$0xff]  ;;  %v433_v31 = vld [vmem:[#allocation11 + $0x118] sm:$0xff] }
  0x3d   :  { %300 = vmatmul.f32.vlgmr.msra.gmra.mxu2 %v1781_v61  ;;  %341 = vmatmul.f32.vlgmr.msra.gmra.mxu3 %v1781_v61  ;;  %v434_v32 = vld [vmem:[#allocation11 + $0x120] sm:$0xff]  ;;  %v435_v33 = vld [vmem:[#allocation11 + $0x128] sm:$0xff]  ;;  %v428_v34 = vld [vmem:[#allocation11 + $0xf0] sm:$0xff] }
  0x3e   :  { %554 = vmatpush.msrb.mxu2 %v460_v62  ;;  %595 = vmatpush.msrb.mxu3 %v461_v63  ;;  %v429_v35 = vld [vmem:[#allocation11 + $0xf8] sm:$0xff]  ;;  %v430_v37 = vld [vmem:[#allocation11 + $0x100] sm:$0xff]  ;;  %v431_v38 = vld [vmem:[#allocation11 + $0x108] sm:$0xff] }
  0x3f   :  { %257 = vmatpush.msra.mxu1 %v133_v1  ;;  %217 = vmatpush.msra.mxu0 %v128_v4  ;;  %v1799_v36 = vld [vmem:[#allocation6 + $0x18] sm:$0xff]  ;;  %v424_v39 = vld [vmem:[#allocation11 + $0xd0] sm:$0xff]  ;;  %v426_v41 = vld [vmem:[#allocation11 + $0xe0] sm:$0xff] }
  0x40   :  { %555 = vmatpush.msrb.mxu2 %v456_v2  ;;  %596 = vmatpush.msrb.mxu3 %v457_v3  ;;  %v425_v40 = vld [vmem:[#allocation11 + $0xd8] sm:$0xff]  ;;  %v427_v42 = vld [vmem:[#allocation11 + $0xe8] sm:$0xff]  ;;  %v420_v43 = vld [vmem:[#allocation11 + $0xb0] sm:$0xff] }
  0x41   :  { %258 = vmatpush.msra.mxu1 %v129_v5  ;;  %218 = vmatmul.f32.vlgmr.msra.gmra.mxu0 %v1781_v61  ;;  %v421_v44 = vld [vmem:[#allocation11 + $0xb8] sm:$0xff]  ;;  %v422_v45 = vld [vmem:[#allocation11 + $0xc0] sm:$0xff]  ;;  %v423_v46 = vld [vmem:[#allocation11 + $0xc8] sm:$0xff] }
  0x42   :  { %259 = vmatmul.f32.vlgmr.msra.gmra.mxu1 %v1781_v61  ;;  %472 = vmatpush.msrb.mxu0 %v458_v6  ;;  %v416_v47 = vld [vmem:[#allocation11 + $0x90] sm:$0xff]  ;;  %v417_v48 = vld [vmem:[#allocation11 + $0x98] sm:$0xff]  ;;  %v1805_v49 = vld [vmem:[#allocation6 + $0x20] sm:$0xff] }
  0x43   :  { %513 = vmatpush.msrb.mxu1 %v459_v7  ;;  %556 = vmatpush.msrb.mxu2 %v452_v8  ;;  %v418_v50 = vld [vmem:[#allocation11 + $0xa0] sm:$0xff]  ;;  %v419_v51 = vld [vmem:[#allocation11 + $0xa8] sm:$0xff]  ;;  %v412_v52 = vld [vmem:[#allocation11 + $0x70] sm:$0xff] }
  0x44   :  { %597 = vmatpush.msrb.mxu3 %v453_v9  ;;  %473 = vmatpush.msrb.mxu0 %v454_v11  ;;  %v413_v53 = vld [vmem:[#allocation11 + $0x78] sm:$0xff]  ;;  %v414_v54 = vld [vmem:[#allocation11 + $0x80] sm:$0xff]  ;;  %v415_v55 = vld [vmem:[#allocation11 + $0x88] sm:$0xff] }
  0x45   :  { %303 = vmatmul.f32.gmra.mxu2 %v1787_v10  ;;  %344 = vmatmul.f32.gmra.mxu3 %v1787_v10  ;;  %v408_v56 = vld [vmem:[#allocation11 + $0x50] sm:$0xff]  ;;  %v409_v57 = vld [vmem:[#allocation11 + $0x58] sm:$0xff]  ;;  %v410_v58 = vld [vmem:[#allocation11 + $0x60] sm:$0xff] }
  0x46   :  { %514 = vmatpush.msrb.mxu1 %v455_v12  ;;  %557 = vmatpush.msrb.mxu2 %v448_v13  ;;  %v411_v59 = vld [vmem:[#allocation11 + $0x68] sm:$0xff]  ;;  %v404_v60 = vld [vmem:[#allocation11 + $0x30] sm:$0xff]  ;;  %v405_v62 = vld [vmem:[#allocation11 + $0x38] sm:$0xff] }
  0x47   :  { %598 = vmatpush.msrb.mxu3 %v449_v14  ;;  %474 = vmatpush.msrb.mxu0 %v450_v15  ;;  %v125_v63 = vld [vmem:[#allocation6 + $0x28] sm:$0xff]  ;;  %v406_v0 = vld [vmem:[#allocation11 + $0x40] sm:$0xff]  ;;  %v400_v2 = vld [vmem:[#allocation11 + $0x10] sm:$0xff] }
  0x48   :  { %515 = vmatpush.msrb.mxu1 %v451_v16  ;;  %558 = vmatpush.msrb.mxu2 %v444_v17  ;;  %v407_v1 = vld [vmem:[#allocation11 + $0x48] sm:$0xff]  ;;  %v401_v3 = vld [vmem:[#allocation11 + $0x18] sm:$0xff]  ;;  %v402_v4 = vld [vmem:[#allocation11 + $0x20] sm:$0xff] }
  0x49   :  { %599 = vmatpush.msrb.mxu3 %v445_v18  ;;  %221 = vmatmul.f32.gmra.mxu0 %v1787_v10  ;;  %v403_v5 = vld [vmem:[#allocation11 + $0x28] sm:$0xff]  ;;  %v398_v6 = vld [vmem:[#allocation11] sm:$0xff]  ;;  %v126_v8 = vld [vmem:[#allocation6 + $0x30] sm:$0xff] }
  0x4a   :  { %262 = vmatmul.f32.gmra.mxu1 %v1787_v10  ;;  %475 = vmatpush.msrb.mxu0 %v446_v19  ;;  %v399_v7 = vld [vmem:[#allocation11 + $0x8] sm:$0xff]  ;;  %v127_v9 = vld [vmem:[#allocation6 + $0x38] sm:$0xff] }
  0x4b   :  { %516 = vmatpush.msrb.mxu1 %v447_v20  ;;  %559 = vmatpush.msrb.mxu2 %v440_v21 }
  0x4c   :  { %600 = vmatpush.msrb.mxu3 %v441_v22  ;;  %476 = vmatpush.msrb.mxu0 %v442_v24 }
  0x4d   :  { %306 = vmatmul.f32.gmra.mxu2 %v1793_v23  ;;  %347 = vmatmul.f32.gmra.mxu3 %v1793_v23 }
  0x4e   :  { %517 = vmatpush.msrb.mxu1 %v443_v25  ;;  %560 = vmatpush.msrb.mxu2 %v436_v26 }
  0x4f   :  { %601 = vmatpush.msrb.mxu3 %v437_v27  ;;  %477 = vmatpush.msrb.mxu0 %v438_v28 }
  0x50   :  { %518 = vmatpush.msrb.mxu1 %v439_v29  ;;  %561 = vmatpush.msrb.mxu2 %v432_v30 }
  0x51   :  { %602 = vmatpush.msrb.mxu3 %v433_v31  ;;  %224 = vmatmul.f32.gmra.mxu0 %v1793_v23 }
  0x52   :  { %265 = vmatmul.f32.gmra.mxu1 %v1793_v23  ;;  %478 = vmatpush.msrb.mxu0 %v434_v32 }
  0x53   :  { %519 = vmatpush.msrb.mxu1 %v435_v33  ;;  %562 = vmatpush.msrb.mxu2 %v428_v34 }
  0x54   :  { %603 = vmatpush.msrb.mxu3 %v429_v35  ;;  %479 = vmatpush.msrb.mxu0 %v430_v37 }
  0x55   :  { %309 = vmatmul.f32.gmra.mxu2 %v1799_v36  ;;  %350 = vmatmul.f32.gmra.mxu3 %v1799_v36 }
  0x56   :  { %520 = vmatpush.msrb.mxu1 %v431_v38  ;;  %563 = vmatpush.msrb.mxu2 %v424_v39 }
  0x57   :  { %604 = vmatpush.msrb.mxu3 %v425_v40  ;;  %480 = vmatpush.msrb.mxu0 %v426_v41 }
  0x58   :  { %521 = vmatpush.msrb.mxu1 %v427_v42  ;;  %564 = vmatpush.msrb.mxu2 %v420_v43 }
  0x59   :  { %605 = vmatpush.msrb.mxu3 %v421_v44  ;;  %227 = vmatmul.f32.gmra.mxu0 %v1799_v36 }
  0x5a   :  { %268 = vmatmul.f32.gmra.mxu1 %v1799_v36  ;;  %481 = vmatpush.msrb.mxu0 %v422_v45 }
  0x5b   :  { %522 = vmatpush.msrb.mxu1 %v423_v46  ;;  %565 = vmatpush.msrb.mxu2 %v416_v47 }
  0x5c   :  { %606 = vmatpush.msrb.mxu3 %v417_v48  ;;  %482 = vmatpush.msrb.mxu0 %v418_v50 }
  0x5d   :  { %312 = vmatmul.f32.gmra.mxu2 %v1805_v49  ;;  %353 = vmatmul.f32.gmra.mxu3 %v1805_v49 }
  0x5e   :  { %523 = vmatpush.msrb.mxu1 %v419_v51  ;;  %566 = vmatpush.msrb.mxu2 %v412_v52 }
  0x5f   :  { %607 = vmatpush.msrb.mxu3 %v413_v53  ;;  %483 = vmatpush.msrb.mxu0 %v414_v54 }
  0x60   :  { %524 = vmatpush.msrb.mxu1 %v415_v55  ;;  %567 = vmatpush.msrb.mxu2 %v408_v56 }
  0x61   :  { %608 = vmatpush.msrb.mxu3 %v409_v57  ;;  %230 = vmatmul.f32.gmra.mxu0 %v1805_v49 }
  0x62   :  { %271 = vmatmul.f32.gmra.mxu1 %v1805_v49  ;;  %484 = vmatpush.msrb.mxu0 %v410_v58 }
  0x63   :  { %525 = vmatpush.msrb.mxu1 %v411_v59  ;;  %568 = vmatpush.msrb.mxu2 %v404_v60 }
  0x64   :  { %609 = vmatpush.msrb.mxu3 %v405_v62  ;;  %485 = vmatpush.msrb.mxu0 %v406_v0 }
  0x65   :  { %315 = vmatmul.f32.gmra.mxu2 %v125_v63  ;;  %356 = vmatmul.f32.gmra.mxu3 %v125_v63 }
  0x66   :  { %526 = vmatpush.msrb.mxu1 %v407_v1  ;;  %569 = vmatpush.msrb.mxu2 %v400_v2 }
  0x67   :  { %610 = vmatpush.msrb.mxu3 %v401_v3  ;;  %486 = vmatpush.msrb.mxu0 %v402_v4 }
  0x68   :  { %527 = vmatpush.msrb.mxu1 %v403_v5 }
  0x69   :  { %233 = vmatmul.f32.gmra.mxu0 %v125_v63 }
  0x6a   :  { %274 = vmatmul.f32.gmra.mxu1 %v125_v63  ;;  %487 = vmatpush.msrb.mxu0 %v398_v6 }
  0x6b   :  { %528 = vmatpush.msrb.mxu1 %v399_v7 }
  0x6d   :  { %318 = vmatmul.f32.gmra.mxu2 %v126_v8  ;;  %359 = vmatmul.f32.gmra.mxu3 %v126_v8 }
  0x71   :  { %236 = vmatmul.f32.gmra.mxu0 %v126_v8 }
  0x72   :  { %277 = vmatmul.f32.gmra.mxu1 %v126_v8 }
  0x75   :  { %321 = vmatmul.f32.gmra.mxu2 %v127_v9  ;;  %362 = vmatmul.f32.gmra.mxu3 %v127_v9 }
  0x79   :  { %239 = vmatmul.f32.gmra.mxu0 %v127_v9 }
  0x7a   :  { %280 = vmatmul.f32.gmra.mxu1 %v127_v9 }
  0x7d   :  { %570 = vmatmul.f32.vlgmr.msrb.gmra.mxu2 %v1781_v61  ;;  %611 = vmatmul.f32.vlgmr.msrb.gmra.mxu3 %v1781_v61 }
  0x81   :  { %488 = vmatmul.f32.vlgmr.msrb.gmra.mxu0 %v1781_v61 }
  0x82   :  { %529 = vmatmul.f32.vlgmr.msrb.gmra.mxu1 %v1781_v61  ;;  %v192_v61 = vld [vmem:[#allocation12] sm:$0xf] }
  0x83   :  { %v1833_v11 = vperm.slane %v192_v61, 1  ;;  %v1835_v12 = vperm.slane %v192_v61, 2  ;;  %v1837_v13 = vperm.slane %v192_v61, 3 }
  0x85   :  { %573 = vmatmul.f32.gmra.mxu2 %v1787_v10  ;;  %614 = vmatmul.f32.gmra.mxu3 %v1787_v10 }
  0x89   :  { %491 = vmatmul.f32.gmra.mxu0 %v1787_v10 }
  0x8a   :  { %532 = vmatmul.f32.gmra.mxu1 %v1787_v10  ;;  %v1831_v10 = vperm.slane %v192_v61, 0 }
  0x8d   :  { %576 = vmatmul.f32.gmra.mxu2 %v1793_v23  ;;  %617 = vmatmul.f32.gmra.mxu3 %v1793_v23 }
  0x91   :  { %494 = vmatmul.f32.gmra.mxu0 %v1793_v23 }
  0x92   :  { %535 = vmatmul.f32.gmra.mxu1 %v1793_v23 }
  0x95   :  { %579 = vmatmul.f32.gmra.mxu2 %v1799_v36  ;;  %620 = vmatmul.f32.gmra.mxu3 %v1799_v36 }
  0x99   :  { %497 = vmatmul.f32.gmra.mxu0 %v1799_v36 }
  0x9a   :  { %538 = vmatmul.f32.gmra.mxu1 %v1799_v36 }
  0x9d   :  { %582 = vmatmul.f32.gmra.mxu2 %v1805_v49  ;;  %623 = vmatmul.f32.gmra.mxu3 %v1805_v49 }
  0xa1   :  { %500 = vmatmul.f32.gmra.mxu0 %v1805_v49 }
  0xa2   :  { %541 = vmatmul.f32.gmra.mxu1 %v1805_v49 }
  0xa5   :  { %585 = vmatmul.f32.gmra.mxu2 %v125_v63  ;;  %626 = vmatmul.f32.gmra.mxu3 %v125_v63 }
  0xa9   :  { %503 = vmatmul.f32.gmra.mxu0 %v125_v63 }
  0xaa   :  { %544 = vmatmul.f32.gmra.mxu1 %v125_v63 }
  0xad   :  { %588 = vmatmul.f32.gmra.mxu2 %v126_v8  ;;  %629 = vmatmul.f32.gmra.mxu3 %v126_v8 }
  0xb1   :  { %506 = vmatmul.f32.gmra.mxu0 %v126_v8 }
  0xb2   :  { %547 = vmatmul.f32.gmra.mxu1 %v126_v8 }
  0xb5   :  { %591 = vmatmul.f32.gmra.mxu2 %v127_v9  ;;  %632 = vmatmul.f32.gmra.mxu3 %v127_v9 }
  0xb9   :  { %509 = vmatmul.f32.gmra.mxu0 %v127_v9 }
  0xba   :  { %550 = vmatmul.f32.gmra.mxu1 %v127_v9 }
  0xbe   :  { %v219_v14 = vpop.f32.mrf.mxu0 }
  0xbf   :  { %v260_v15 = vpop.f32.mrf.mxu1  ;;  %v220_v16 = vadd.f32 %v219_v14, %v1831_v10 }
  0xc0   :  { %v261_v17 = vadd.f32 %v260_v15, %v1833_v11  ;;  %v301_v18 = vpop.f32.mrf.mxu2  ;;  %v342_v19 = vpop.f32.mrf.mxu3 }
  0xc1   :  { %v302_v20 = vadd.f32 %v301_v18, %v1835_v12  ;;  %v343_v21 = vadd.f32 %v342_v19, %v1837_v13  ;;  %366 = vst [vmem:[#allocation2] sm:$0xff] %v220_v16  ;;  %v462_v18 = vld [vmem:[#allocation14] sm:$0xf] }
  0xc2   :  { %367 = vst [vmem:[#allocation2 + $0x8] sm:$0xff] %v261_v17  ;;  %v1871_v19 = vperm.slane %v462_v18, 0 }
  0xc3   :  { %368 = vst [vmem:[#allocation2 + $0x10] sm:$0xff] %v302_v20  ;;  %v1873_v20 = vperm.slane %v462_v18, 1 }
  0xc4   :  { %369 = vst [vmem:[#allocation2 + $0x18] sm:$0xff] %v343_v21  ;;  %v1875_v21 = vperm.slane %v462_v18, 2 }
  0xc6   :  { %v222_v22 = vpop.f32.mrf.mxu0 }
  0xc7   :  { %v263_v23 = vpop.f32.mrf.mxu1  ;;  %v223_v24 = vadd.f32 %v222_v22, %v1831_v10 }
  0xc8   :  { %v264_v25 = vadd.f32 %v263_v23, %v1833_v11  ;;  %v304_v26 = vpop.f32.mrf.mxu2  ;;  %v345_v27 = vpop.f32.mrf.mxu3 }
  0xc9   :  { %v305_v28 = vadd.f32 %v304_v26, %v1835_v12  ;;  %v346_v29 = vadd.f32 %v345_v27, %v1837_v13  ;;  %370 = vst [vmem:[#allocation2 + $0x20] sm:$0xff] %v223_v24 }
  0xca   :  { %371 = vst [vmem:[#allocation2 + $0x28] sm:$0xff] %v264_v25 }
  0xcb   :  { %372 = vst [vmem:[#allocation2 + $0x30] sm:$0xff] %v305_v28 }
  0xcc   :  { %373 = vst [vmem:[#allocation2 + $0x38] sm:$0xff] %v346_v29 }
  0xce   :  { %v225_v30 = vpop.f32.mrf.mxu0 }
  0xcf   :  { %v266_v31 = vpop.f32.mrf.mxu1  ;;  %v226_v32 = vadd.f32 %v225_v30, %v1831_v10 }
  0xd0   :  { %v267_v33 = vadd.f32 %v266_v31, %v1833_v11  ;;  %v307_v34 = vpop.f32.mrf.mxu2  ;;  %v348_v35 = vpop.f32.mrf.mxu3 }
  0xd1   :  { %v308_v36 = vadd.f32 %v307_v34, %v1835_v12  ;;  %v349_v37 = vadd.f32 %v348_v35, %v1837_v13  ;;  %374 = vst [vmem:[#allocation2 + $0x40] sm:$0xff] %v226_v32 }
  0xd2   :  { %375 = vst [vmem:[#allocation2 + $0x48] sm:$0xff] %v267_v33 }
  0xd3   :  { %376 = vst [vmem:[#allocation2 + $0x50] sm:$0xff] %v308_v36 }
  0xd4   :  { %377 = vst [vmem:[#allocation2 + $0x58] sm:$0xff] %v349_v37 }
  0xd6   :  { %v228_v38 = vpop.f32.mrf.mxu0 }
  0xd7   :  { %v269_v39 = vpop.f32.mrf.mxu1  ;;  %v229_v40 = vadd.f32 %v228_v38, %v1831_v10 }
  0xd8   :  { %v270_v41 = vadd.f32 %v269_v39, %v1833_v11  ;;  %v310_v42 = vpop.f32.mrf.mxu2  ;;  %v351_v43 = vpop.f32.mrf.mxu3 }
  0xd9   :  { %v311_v44 = vadd.f32 %v310_v42, %v1835_v12  ;;  %v352_v45 = vadd.f32 %v351_v43, %v1837_v13  ;;  %378 = vst [vmem:[#allocation2 + $0x60] sm:$0xff] %v229_v40 }
  0xda   :  { %379 = vst [vmem:[#allocation2 + $0x68] sm:$0xff] %v270_v41 }
  0xdb   :  { %380 = vst [vmem:[#allocation2 + $0x70] sm:$0xff] %v311_v44 }
  0xdc   :  { %381 = vst [vmem:[#allocation2 + $0x78] sm:$0xff] %v352_v45 }
  0xde   :  { %v231_v46 = vpop.f32.mrf.mxu0 }
  0xdf   :  { %v272_v47 = vpop.f32.mrf.mxu1  ;;  %v232_v48 = vadd.f32 %v231_v46, %v1831_v10 }
  0xe0   :  { %v273_v49 = vadd.f32 %v272_v47, %v1833_v11  ;;  %v313_v50 = vpop.f32.mrf.mxu2  ;;  %v354_v51 = vpop.f32.mrf.mxu3 }
  0xe1   :  { %v314_v52 = vadd.f32 %v313_v50, %v1835_v12  ;;  %v355_v53 = vadd.f32 %v354_v51, %v1837_v13  ;;  %382 = vst [vmem:[#allocation2 + $0x80] sm:$0xff] %v232_v48 }
  0xe2   :  { %383 = vst [vmem:[#allocation2 + $0x88] sm:$0xff] %v273_v49 }
  0xe3   :  { %384 = vst [vmem:[#allocation2 + $0x90] sm:$0xff] %v314_v52 }
  0xe4   :  { %385 = vst [vmem:[#allocation2 + $0x98] sm:$0xff] %v355_v53 }
  0xe6   :  { %v234_v54 = vpop.f32.mrf.mxu0 }
  0xe7   :  { %v275_v55 = vpop.f32.mrf.mxu1  ;;  %v235_v56 = vadd.f32 %v234_v54, %v1831_v10 }
  0xe8   :  { %v276_v57 = vadd.f32 %v275_v55, %v1833_v11  ;;  %v316_v58 = vpop.f32.mrf.mxu2  ;;  %v357_v59 = vpop.f32.mrf.mxu3 }
  0xe9   :  { %v317_v60 = vadd.f32 %v316_v58, %v1835_v12  ;;  %v358_v62 = vadd.f32 %v357_v59, %v1837_v13  ;;  %386 = vst [vmem:[#allocation2 + $0xa0] sm:$0xff] %v235_v56 }
  0xea   :  { %387 = vst [vmem:[#allocation2 + $0xa8] sm:$0xff] %v276_v57 }
  0xeb   :  { %388 = vst [vmem:[#allocation2 + $0xb0] sm:$0xff] %v317_v60 }
  0xec   :  { %389 = vst [vmem:[#allocation2 + $0xb8] sm:$0xff] %v358_v62 }
  0xee   :  { %v237_v63 = vpop.f32.mrf.mxu0 }
  0xef   :  { %v278_v0 = vpop.f32.mrf.mxu1  ;;  %v238_v1 = vadd.f32 %v237_v63, %v1831_v10 }
  0xf0   :  { %v279_v2 = vadd.f32 %v278_v0, %v1833_v11  ;;  %v319_v3 = vpop.f32.mrf.mxu2  ;;  %v360_v4 = vpop.f32.mrf.mxu3 }
  0xf1   :  { %v320_v5 = vadd.f32 %v319_v3, %v1835_v12  ;;  %v361_v6 = vadd.f32 %v360_v4, %v1837_v13  ;;  %390 = vst [vmem:[#allocation2 + $0xc0] sm:$0xff] %v238_v1 }
  0xf2   :  { %391 = vst [vmem:[#allocation2 + $0xc8] sm:$0xff] %v279_v2 }
  0xf3   :  { %392 = vst [vmem:[#allocation2 + $0xd0] sm:$0xff] %v320_v5 }
  0xf4   :  { %393 = vst [vmem:[#allocation2 + $0xd8] sm:$0xff] %v361_v6 }
  0xf6   :  { %v240_v7 = vpop.f32.mrf.mxu0 }
  0xf7   :  { %v281_v8 = vpop.f32.mrf.mxu1  ;;  %v241_v9 = vadd.f32 %v240_v7, %v1831_v10  ;;  %v1877_v10 = vperm.slane %v462_v18, 3 }
  0xf8   :  { %v282_v61 = vadd.f32 %v281_v8, %v1833_v11  ;;  %v322_v14 = vpop.f32.mrf.mxu2  ;;  %v363_v15 = vpop.f32.mrf.mxu3 }
  0xf9   :  { %v323_v16 = vadd.f32 %v322_v14, %v1835_v12  ;;  %v364_v17 = vadd.f32 %v363_v15, %v1837_v13  ;;  %394 = vst [vmem:[#allocation2 + $0xe0] sm:$0xff] %v241_v9 }
  0xfa   :  { %395 = vst [vmem:[#allocation2 + $0xe8] sm:$0xff] %v282_v61 }
  0xfb   :  { %396 = vst [vmem:[#allocation2 + $0xf0] sm:$0xff] %v323_v16 }
  0xfc   :  { %397 = vst [vmem:[#allocation2 + $0xf8] sm:$0xff] %v364_v17 }
  0xfe   :  { %v489_v11 = vpop.f32.mrf.mxu0 }
  0xff   :  { %v530_v22 = vpop.f32.mrf.mxu1  ;;  %v490_v23 = vadd.f32 %v489_v11, %v1871_v19 }
 0x100   :  { %v531_v12 = vadd.f32 %v530_v22, %v1873_v20  ;;  %v571_v13 = vpop.f32.mrf.mxu2  ;;  %v612_v24 = vpop.f32.mrf.mxu3 }
 0x101   :  { %v572_v25 = vadd.f32 %v571_v13, %v1875_v21  ;;  %v613_v26 = vadd.f32 %v612_v24, %v1877_v10  ;;  %636 = vst [vmem:[#allocation3] sm:$0xff] %v490_v23 }
 0x102   :  { %637 = vst [vmem:[#allocation3 + $0x8] sm:$0xff] %v531_v12 }
 0x103   :  { %638 = vst [vmem:[#allocation3 + $0x10] sm:$0xff] %v572_v25 }
 0x104   :  { %639 = vst [vmem:[#allocation3 + $0x18] sm:$0xff] %v613_v26 }
 0x106   :  { %v492_v27 = vpop.f32.mrf.mxu0 }
 0x107   :  { %v533_v28 = vpop.f32.mrf.mxu1  ;;  %v493_v29 = vadd.f32 %v492_v27, %v1871_v19 }
 0x108   :  { %v534_v30 = vadd.f32 %v533_v28, %v1873_v20  ;;  %v574_v31 = vpop.f32.mrf.mxu2  ;;  %v615_v32 = vpop.f32.mrf.mxu3 }
 0x109   :  { %v575_v33 = vadd.f32 %v574_v31, %v1875_v21  ;;  %v616_v34 = vadd.f32 %v615_v32, %v1877_v10  ;;  %640 = vst [vmem:[#allocation3 + $0x20] sm:$0xff] %v493_v29 }
 0x10a   :  { %641 = vst [vmem:[#allocation3 + $0x28] sm:$0xff] %v534_v30 }
 0x10b   :  { %642 = vst [vmem:[#allocation3 + $0x30] sm:$0xff] %v575_v33 }
 0x10c   :  { %643 = vst [vmem:[#allocation3 + $0x38] sm:$0xff] %v616_v34 }
 0x10e   :  { %v495_v35 = vpop.f32.mrf.mxu0 }
 0x10f   :  { %v536_v36 = vpop.f32.mrf.mxu1  ;;  %v496_v37 = vadd.f32 %v495_v35, %v1871_v19 }
 0x110   :  { %v537_v38 = vadd.f32 %v536_v36, %v1873_v20  ;;  %v577_v39 = vpop.f32.mrf.mxu2  ;;  %v618_v40 = vpop.f32.mrf.mxu3 }
 0x111   :  { %v578_v41 = vadd.f32 %v577_v39, %v1875_v21  ;;  %v619_v42 = vadd.f32 %v618_v40, %v1877_v10  ;;  %644 = vst [vmem:[#allocation3 + $0x40] sm:$0xff] %v496_v37 }
 0x112   :  { %645 = vst [vmem:[#allocation3 + $0x48] sm:$0xff] %v537_v38 }
 0x113   :  { %646 = vst [vmem:[#allocation3 + $0x50] sm:$0xff] %v578_v41 }
 0x114   :  { %647 = vst [vmem:[#allocation3 + $0x58] sm:$0xff] %v619_v42 }
 0x116   :  { %v498_v43 = vpop.f32.mrf.mxu0 }
 0x117   :  { %v539_v44 = vpop.f32.mrf.mxu1  ;;  %v499_v45 = vadd.f32 %v498_v43, %v1871_v19 }
 0x118   :  { %v540_v46 = vadd.f32 %v539_v44, %v1873_v20  ;;  %v580_v47 = vpop.f32.mrf.mxu2  ;;  %v621_v48 = vpop.f32.mrf.mxu3 }
 0x119   :  { %v581_v49 = vadd.f32 %v580_v47, %v1875_v21  ;;  %v622_v50 = vadd.f32 %v621_v48, %v1877_v10  ;;  %648 = vst [vmem:[#allocation3 + $0x60] sm:$0xff] %v499_v45 }
 0x11a   :  { %649 = vst [vmem:[#allocation3 + $0x68] sm:$0xff] %v540_v46 }
 0x11b   :  { %650 = vst [vmem:[#allocation3 + $0x70] sm:$0xff] %v581_v49 }
 0x11c   :  { %651 = vst [vmem:[#allocation3 + $0x78] sm:$0xff] %v622_v50 }
 0x11e   :  { %v501_v51 = vpop.f32.mrf.mxu0 }
 0x11f   :  { %v542_v52 = vpop.f32.mrf.mxu1  ;;  %v502_v53 = vadd.f32 %v501_v51, %v1871_v19 }
 0x120   :  { %v543_v54 = vadd.f32 %v542_v52, %v1873_v20  ;;  %v583_v55 = vpop.f32.mrf.mxu2  ;;  %v624_v56 = vpop.f32.mrf.mxu3 }
 0x121   :  { %v584_v57 = vadd.f32 %v583_v55, %v1875_v21  ;;  %v625_v58 = vadd.f32 %v624_v56, %v1877_v10  ;;  %652 = vst [vmem:[#allocation3 + $0x80] sm:$0xff] %v502_v53 }
 0x122   :  { %653 = vst [vmem:[#allocation3 + $0x88] sm:$0xff] %v543_v54 }
 0x123   :  { %654 = vst [vmem:[#allocation3 + $0x90] sm:$0xff] %v584_v57 }
 0x124   :  { %655 = vst [vmem:[#allocation3 + $0x98] sm:$0xff] %v625_v58 }
 0x126   :  { %v504_v59 = vpop.f32.mrf.mxu0 }
 0x127   :  { %v545_v60 = vpop.f32.mrf.mxu1  ;;  %v505_v62 = vadd.f32 %v504_v59, %v1871_v19 }
 0x128   :  { %v546_v63 = vadd.f32 %v545_v60, %v1873_v20  ;;  %v586_v0 = vpop.f32.mrf.mxu2  ;;  %v627_v1 = vpop.f32.mrf.mxu3 }
 0x129   :  { %v587_v2 = vadd.f32 %v586_v0, %v1875_v21  ;;  %v628_v3 = vadd.f32 %v627_v1, %v1877_v10  ;;  %656 = vst [vmem:[#allocation3 + $0xa0] sm:$0xff] %v505_v62 }
 0x12a   :  { %657 = vst [vmem:[#allocation3 + $0xa8] sm:$0xff] %v546_v63 }
 0x12b   :  { %658 = vst [vmem:[#allocation3 + $0xb0] sm:$0xff] %v587_v2 }
 0x12c   :  { %659 = vst [vmem:[#allocation3 + $0xb8] sm:$0xff] %v628_v3 }
 0x12e   :  { %v507_v4 = vpop.f32.mrf.mxu0 }
 0x12f   :  { %v548_v5 = vpop.f32.mrf.mxu1  ;;  %v508_v6 = vadd.f32 %v507_v4, %v1871_v19 }
 0x130   :  { %v549_v7 = vadd.f32 %v548_v5, %v1873_v20  ;;  %v589_v8 = vpop.f32.mrf.mxu2  ;;  %v630_v9 = vpop.f32.mrf.mxu3 }
 0x131   :  { %v590_v61 = vadd.f32 %v589_v8, %v1875_v21  ;;  %v631_v14 = vadd.f32 %v630_v9, %v1877_v10  ;;  %660 = vst [vmem:[#allocation3 + $0xc0] sm:$0xff] %v508_v6 }
 0x132   :  { %661 = vst [vmem:[#allocation3 + $0xc8] sm:$0xff] %v549_v7 }
 0x133   :  { %662 = vst [vmem:[#allocation3 + $0xd0] sm:$0xff] %v590_v61 }
 0x134   :  { %663 = vst [vmem:[#allocation3 + $0xd8] sm:$0xff] %v631_v14 }
 0x136   :  { %v510_v15 = vpop.f32.mrf.mxu0 }
 0x137   :  { %v551_v16 = vpop.f32.mrf.mxu1  ;;  %v511_v17 = vadd.f32 %v510_v15, %v1871_v19 }
 0x138   :  { %v552_v18 = vadd.f32 %v551_v16, %v1873_v20  ;;  %v592_v11 = vpop.f32.mrf.mxu2  ;;  %v633_v22 = vpop.f32.mrf.mxu3 }
 0x139   :  { %v593_v23 = vadd.f32 %v592_v11, %v1875_v21  ;;  %v634_v12 = vadd.f32 %v633_v22, %v1877_v10  ;;  %664 = vst [vmem:[#allocation3 + $0xe0] sm:$0xff] %v511_v17 }
 0x13a   :  { %665 = vst [vmem:[#allocation3 + $0xe8] sm:$0xff] %v552_v18 }
 0x13b   :  { %666 = vst [vmem:[#allocation3 + $0xf0] sm:$0xff] %v593_v23 }
 0x13c   :  { %667 = vst [vmem:[#allocation3 + $0xf8] sm:$0xff] %v634_v12 }
 0x13d LB: > { %v798_v19 = vld [vmem:[#allocation15 + $0x3c0] sm:$0xff]  ;;  %v799_v20 = vld [vmem:[#allocation15 + $0x3c8] sm:$0xff]  ;;  %s1466_s5 = sshll.u32 %s1710_s4, 5  ;;  %s1468_s30 = sshll.u32 %s1710_s4, 4  ;;  %s1710_s4 = sphi %s1911_s4, %s673_s4  }
 0x13e   : > { %v926_v13 = vld [vmem:[#allocation15 + $0x7c0] sm:$0xff]  ;;  %934 = vmatpush.msra.mxu0 %v798_v19  ;;  %v927_v24 = vld [vmem:[#allocation15 + $0x7c8] sm:$0xff]  ;;  %974 = vmatpush.msra.mxu2 %v799_v20  ;;  %v800_v19 = vld [vmem:[#allocation15 + $0x3d0] sm:$0xff]  ;;  %s1937_s29 = scalar_lea.vmem [#allocation2], %s1466_s5  ;;  %s675_s7 = ssub.s32 7, %s1710_s4 }
 0x13f   : > { %954 = vmatpush.msra.mxu1 %v926_v13  ;;  %v790_v21 = vld [vmem:[#allocation15 + $0x380] sm:$0xff]  ;;  %994 = vmatpush.msra.mxu3 %v927_v24  ;;  %v791_v10 = vld [vmem:[#allocation15 + $0x388] sm:$0xff]  ;;  %v928_v13 = vld [vmem:[#allocation15 + $0x7d0] sm:$0xff]  ;;  %s1411_s8 = scalar_lea.vmem [#allocation17], %s1468_s30  ;;  %s1467_s9 = sshll.u32 %s675_s7, 5 }
 0x140   : > { %v918_v25 = vld [vmem:[#allocation15 + $0x780] sm:$0xff]  ;;  %v919_v26 = vld [vmem:[#allocation15 + $0x788] sm:$0xff]  ;;  %935 = vmatpush.msra.mxu0 %v790_v21  ;;  %975 = vmatpush.msra.mxu2 %v791_v10  ;;  %v801_v20 = vld [vmem:[#allocation15 + $0x3d8] sm:$0xff]  ;;  %s1954_s10 = scalar_lea.vmem [#allocation3], %s1467_s9  ;;  %s1469_s11 = sshll.u32 %s675_s7, 4 }
 0x141   : > { %v782_v27 = vld [vmem:[#allocation15 + $0x340] sm:$0xff]  ;;  %955 = vmatpush.msra.mxu1 %v918_v25  ;;  %v783_v29 = vld [vmem:[#allocation15 + $0x348] sm:$0xff]  ;;  %995 = vmatpush.msra.mxu3 %v919_v26  ;;  %v929_v24 = vld [vmem:[#allocation15 + $0x7d8] sm:$0xff]  ;;  %s1415_s1 = scalar_lea.vmem [#allocation17], %s1469_s11  ;;  %s673_s4 = sadd.s32 1, %s1710_s4  }
 0x142   : > { %v910_v28 = vld [vmem:[#allocation15 + $0x740] sm:$0xff]  ;;  %v911_v30 = vld [vmem:[#allocation15 + $0x748] sm:$0xff]  ;;  %936 = vmatpush.msra.mxu0 %v782_v27  ;;  %976 = vmatpush.msra.mxu2 %v783_v29  ;;  %v792_v21 = vld [vmem:[#allocation15 + $0x390] sm:$0xff]  ;;  %p670_p0 = scmp.ge.s32.totalorder %s673_s4, 8  }
 0x143   : > { %v774_v31 = vld [vmem:[#allocation15 + $0x300] sm:$0xff]  ;;  %956 = vmatpush.msra.mxu1 %v910_v28  ;;  %v775_v33 = vld [vmem:[#allocation15 + $0x308] sm:$0xff]  ;;  %996 = vmatpush.msra.mxu3 %v911_v30  ;;  %v920_v25 = vld [vmem:[#allocation15 + $0x790] sm:$0xff]  ;;  %s1423_s14 = sshll.u32 (%p670_p0), %s1980_s6, 4  ;;  %s1725_s3 = smov (%p670_p0), [#allocation17]   ;;  %s1424_s14 = int_to_ptr.hbm [resolvable:$true] %s1423_s14 }
 0x144   : > { %v902_v32 = vld [vmem:[#allocation15 + $0x700] sm:$0xff]  ;;  %v903_v34 = vld [vmem:[#allocation15 + $0x708] sm:$0xff]  ;;  %937 = vmatpush.msra.mxu0 %v774_v31  ;;  %977 = vmatpush.msra.mxu2 %v775_v33  ;;  %v793_v10 = vld [vmem:[#allocation15 + $0x398] sm:$0xff]  ;;  %s1421_s15 = sshll.u32 (%p670_p0), %s1725_s3, 4  ;;  %s1726_s16 = smov (%p670_p0), 256   ;;  %s1422_s15 = int_to_ptr.vmem [resolvable:$true] %s1421_s15 }
 0x145   : > { %v766_v35 = vld [vmem:[#allocation15 + $0x2c0] sm:$0xff]  ;;  %957 = vmatpush.msra.mxu1 %v902_v32  ;;  %v767_v37 = vld [vmem:[#allocation15 + $0x2c8] sm:$0xff]  ;;  %997 = vmatpush.msra.mxu3 %v903_v34  ;;  %v921_v26 = vld [vmem:[#allocation15 + $0x798] sm:$0xff]  ;;  %s1727_s17 = smov (%p670_p0), 16  }
 0x146   : > { %v894_v36 = vld [vmem:[#allocation15 + $0x6c0] sm:$0xff]  ;;  %v895_v38 = vld [vmem:[#allocation15 + $0x6c8] sm:$0xff]  ;;  %938 = vmatpush.msra.mxu0 %v766_v35  ;;  %978 = vmatpush.msra.mxu2 %v767_v37  ;;  %v784_v27 = vld [vmem:[#allocation15 + $0x350] sm:$0xff] }
 0x147   : > { %v758_v39 = vld [vmem:[#allocation15 + $0x280] sm:$0xff]  ;;  %958 = vmatpush.msra.mxu1 %v894_v36  ;;  %v759_v41 = vld [vmem:[#allocation15 + $0x288] sm:$0xff]  ;;  %998 = vmatpush.msra.mxu3 %v895_v38  ;;  %v912_v28 = vld [vmem:[#allocation15 + $0x750] sm:$0xff] }
 0x148   : > { %v886_v40 = vld [vmem:[#allocation15 + $0x680] sm:$0xff]  ;;  %v887_v42 = vld [vmem:[#allocation15 + $0x688] sm:$0xff]  ;;  %939 = vmatpush.msra.mxu0 %v758_v39  ;;  %979 = vmatpush.msra.mxu2 %v759_v41  ;;  %v785_v29 = vld [vmem:[#allocation15 + $0x358] sm:$0xff] }
 0x149   : > { %v750_v43 = vld [vmem:[#allocation15 + $0x240] sm:$0xff]  ;;  %959 = vmatpush.msra.mxu1 %v886_v40  ;;  %v751_v45 = vld [vmem:[#allocation15 + $0x248] sm:$0xff]  ;;  %999 = vmatpush.msra.mxu3 %v887_v42  ;;  %v913_v30 = vld [vmem:[#allocation15 + $0x758] sm:$0xff] }
 0x14a   : > { %v878_v44 = vld [vmem:[#allocation15 + $0x640] sm:$0xff]  ;;  %v879_v46 = vld [vmem:[#allocation15 + $0x648] sm:$0xff]  ;;  %940 = vmatpush.msra.mxu0 %v750_v43  ;;  %980 = vmatpush.msra.mxu2 %v751_v45  ;;  %v776_v31 = vld [vmem:[#allocation15 + $0x310] sm:$0xff] }
 0x14b   : > { %v742_v47 = vld [vmem:[#allocation15 + $0x200] sm:$0xff]  ;;  %960 = vmatpush.msra.mxu1 %v878_v44  ;;  %v743_v49 = vld [vmem:[#allocation15 + $0x208] sm:$0xff]  ;;  %1000 = vmatpush.msra.mxu3 %v879_v46  ;;  %v904_v32 = vld [vmem:[#allocation15 + $0x710] sm:$0xff] }
 0x14c   : > { %v870_v48 = vld [vmem:[#allocation15 + $0x600] sm:$0xff]  ;;  %v871_v50 = vld [vmem:[#allocation15 + $0x608] sm:$0xff]  ;;  %941 = vmatpush.msra.mxu0 %v742_v47  ;;  %981 = vmatpush.msra.mxu2 %v743_v49  ;;  %v777_v33 = vld [vmem:[#allocation15 + $0x318] sm:$0xff] }
 0x14d   : > { %v734_v51 = vld [vmem:[#allocation15 + $0x1c0] sm:$0xff]  ;;  %961 = vmatpush.msra.mxu1 %v870_v48  ;;  %v735_v53 = vld [vmem:[#allocation15 + $0x1c8] sm:$0xff]  ;;  %1001 = vmatpush.msra.mxu3 %v871_v50  ;;  %v905_v34 = vld [vmem:[#allocation15 + $0x718] sm:$0xff] }
 0x14e   : > { %v862_v52 = vld [vmem:[#allocation15 + $0x5c0] sm:$0xff]  ;;  %v863_v54 = vld [vmem:[#allocation15 + $0x5c8] sm:$0xff]  ;;  %942 = vmatpush.msra.mxu0 %v734_v51  ;;  %982 = vmatpush.msra.mxu2 %v735_v53  ;;  %v768_v35 = vld [vmem:[#allocation15 + $0x2d0] sm:$0xff] }
 0x14f   : > { %v726_v55 = vld [vmem:[#allocation15 + $0x180] sm:$0xff]  ;;  %962 = vmatpush.msra.mxu1 %v862_v52  ;;  %v727_v57 = vld [vmem:[#allocation15 + $0x188] sm:$0xff]  ;;  %1002 = vmatpush.msra.mxu3 %v863_v54  ;;  %v896_v36 = vld [vmem:[#allocation15 + $0x6d0] sm:$0xff] }
 0x150   : > { %v854_v56 = vld [vmem:[#allocation15 + $0x580] sm:$0xff]  ;;  %v855_v58 = vld [vmem:[#allocation15 + $0x588] sm:$0xff]  ;;  %943 = vmatpush.msra.mxu0 %v726_v55  ;;  %983 = vmatpush.msra.mxu2 %v727_v57  ;;  %v769_v37 = vld [vmem:[#allocation15 + $0x2d8] sm:$0xff] }
 0x151   : > { %v718_v59 = vld [vmem:[#allocation15 + $0x140] sm:$0xff]  ;;  %963 = vmatpush.msra.mxu1 %v854_v56  ;;  %v719_v62 = vld [vmem:[#allocation15 + $0x148] sm:$0xff]  ;;  %1003 = vmatpush.msra.mxu3 %v855_v58  ;;  %v897_v38 = vld [vmem:[#allocation15 + $0x6d8] sm:$0xff] }
 0x152   : > { %v846_v60 = vld [vmem:[#allocation15 + $0x540] sm:$0xff]  ;;  %v847_v63 = vld [vmem:[#allocation15 + $0x548] sm:$0xff]  ;;  %944 = vmatpush.msra.mxu0 %v718_v59  ;;  %984 = vmatpush.msra.mxu2 %v719_v62  ;;  %v760_v39 = vld [vmem:[#allocation15 + $0x290] sm:$0xff] }
 0x153   : > { %v710_v0 = vld [vmem:[#allocation15 + $0x100] sm:$0xff]  ;;  %964 = vmatpush.msra.mxu1 %v846_v60  ;;  %v711_v2 = vld [vmem:[#allocation15 + $0x108] sm:$0xff]  ;;  %1004 = vmatpush.msra.mxu3 %v847_v63  ;;  %v888_v40 = vld [vmem:[#allocation15 + $0x690] sm:$0xff] }
 0x154   : > { %v838_v1 = vld [vmem:[#allocation15 + $0x500] sm:$0xff]  ;;  %v839_v3 = vld [vmem:[#allocation15 + $0x508] sm:$0xff]  ;;  %945 = vmatpush.msra.mxu0 %v710_v0  ;;  %985 = vmatpush.msra.mxu2 %v711_v2  ;;  %v761_v41 = vld [vmem:[#allocation15 + $0x298] sm:$0xff] }
 0x155   : > { %v702_v4 = vld [vmem:[#allocation15 + $0xc0] sm:$0xff]  ;;  %965 = vmatpush.msra.mxu1 %v838_v1  ;;  %v703_v6 = vld [vmem:[#allocation15 + $0xc8] sm:$0xff]  ;;  %1005 = vmatpush.msra.mxu3 %v839_v3  ;;  %v889_v42 = vld [vmem:[#allocation15 + $0x698] sm:$0xff] }
 0x156   : > { %v830_v5 = vld [vmem:[#allocation15 + $0x4c0] sm:$0xff]  ;;  %v831_v7 = vld [vmem:[#allocation15 + $0x4c8] sm:$0xff]  ;;  %946 = vmatpush.msra.mxu0 %v702_v4  ;;  %986 = vmatpush.msra.mxu2 %v703_v6  ;;  %v1916_v43 = vld [vmem:[#allocation4] sm:$0xff] }
 0x157   : > { %v694_v8 = vld [vmem:[#allocation15 + $0x80] sm:$0xff]  ;;  %966 = vmatpush.msra.mxu1 %v830_v5  ;;  %v695_v61 = vld [vmem:[#allocation15 + $0x88] sm:$0xff]  ;;  %1006 = vmatpush.msra.mxu3 %v831_v7  ;;  %v752_v45 = vld [vmem:[#allocation15 + $0x250] sm:$0xff] }
 0x158   : > { %v822_v9 = vld [vmem:[#allocation15 + $0x480] sm:$0xff]  ;;  %v823_v14 = vld [vmem:[#allocation15 + $0x488] sm:$0xff]  ;;  %947 = vmatpush.msra.mxu0 %v694_v8  ;;  %987 = vmatpush.msra.mxu2 %v695_v61  ;;  %v880_v46 = vld [vmem:[#allocation15 + $0x650] sm:$0xff] }
 0x159   : > { %v686_v15 = vld [vmem:[#allocation15 + $0x40] sm:$0xff]  ;;  %967 = vmatpush.msra.mxu1 %v822_v9  ;;  %v687_v17 = vld [vmem:[#allocation15 + $0x48] sm:$0xff]  ;;  %1007 = vmatpush.msra.mxu3 %v823_v14  ;;  %v753_v47 = vld [vmem:[#allocation15 + $0x258] sm:$0xff] }
 0x15a   : > { %v814_v16 = vld [vmem:[#allocation15 + $0x440] sm:$0xff]  ;;  %v815_v18 = vld [vmem:[#allocation15 + $0x448] sm:$0xff]  ;;  %948 = vmatpush.msra.mxu0 %v686_v15  ;;  %988 = vmatpush.msra.mxu2 %v687_v17  ;;  %v881_v48 = vld [vmem:[#allocation15 + $0x658] sm:$0xff] }
 0x15b   : > { %v678_v11 = vld [vmem:[#allocation15] sm:$0xff]  ;;  %968 = vmatpush.msra.mxu1 %v814_v16  ;;  %v679_v23 = vld [vmem:[#allocation15 + $0x8] sm:$0xff]  ;;  %1008 = vmatpush.msra.mxu3 %v815_v18  ;;  %v744_v49 = vld [vmem:[#allocation15 + $0x210] sm:$0xff] }
 0x15c   : > { %v806_v22 = vld [vmem:[#allocation15 + $0x400] sm:$0xff]  ;;  %v807_v12 = vld [vmem:[#allocation15 + $0x408] sm:$0xff]  ;;  %949 = vmatpush.msra.mxu0 %v678_v11  ;;  %989 = vmatpush.msra.mxu2 %v679_v23  ;;  %v872_v50 = vld [vmem:[#allocation15 + $0x610] sm:$0xff] }
 0x15d   : > { %969 = vmatpush.msra.mxu1 %v806_v22  ;;  %1009 = vmatpush.msra.mxu3 %v807_v12  ;;  %v1918_v44 = vld [vmem:[#allocation4 + $0x8] sm:$0xff]  ;;  %v745_v51 = vld [vmem:[#allocation15 + $0x218] sm:$0xff]  ;;  %v736_v53 = vld [vmem:[#allocation15 + $0x1d0] sm:$0xff] }
 0x15e   : > { %1014 = vmatpush.msrb.mxu0 %v800_v19  ;;  %1054 = vmatpush.msrb.mxu2 %v801_v20  ;;  %v873_v52 = vld [vmem:[#allocation15 + $0x618] sm:$0xff]  ;;  %v864_v54 = vld [vmem:[#allocation15 + $0x5d0] sm:$0xff]  ;;  %v802_v20 = vld [vmem:[#allocation15 + $0x3e0] sm:$0xff] }
 0x15f   : > { %1034 = vmatpush.msrb.mxu1 %v928_v13  ;;  %1074 = vmatpush.msrb.mxu3 %v929_v24  ;;  %v737_v55 = vld [vmem:[#allocation15 + $0x1d8] sm:$0xff]  ;;  %v728_v57 = vld [vmem:[#allocation15 + $0x190] sm:$0xff]  ;;  %v930_v24 = vld [vmem:[#allocation15 + $0x7e0] sm:$0xff] }
 0x160   : > { %1015 = vmatpush.msrb.mxu0 %v792_v21  ;;  %1055 = vmatpush.msrb.mxu2 %v793_v10  ;;  %v865_v56 = vld [vmem:[#allocation15 + $0x5d8] sm:$0xff]  ;;  %v856_v58 = vld [vmem:[#allocation15 + $0x590] sm:$0xff]  ;;  %v803_v21 = vld [vmem:[#allocation15 + $0x3e8] sm:$0xff] }
 0x161   : > { %1035 = vmatpush.msrb.mxu1 %v920_v25  ;;  %1075 = vmatpush.msrb.mxu3 %v921_v26  ;;  %v729_v59 = vld [vmem:[#allocation15 + $0x198] sm:$0xff]  ;;  %v720_v62 = vld [vmem:[#allocation15 + $0x150] sm:$0xff]  ;;  %v931_v25 = vld [vmem:[#allocation15 + $0x7e8] sm:$0xff] }
 0x162   : > { %1016 = vmatpush.msrb.mxu0 %v784_v27  ;;  %1056 = vmatpush.msrb.mxu2 %v785_v29  ;;  %v857_v60 = vld [vmem:[#allocation15 + $0x598] sm:$0xff]  ;;  %v848_v63 = vld [vmem:[#allocation15 + $0x550] sm:$0xff]  ;;  %v794_v10 = vld [vmem:[#allocation15 + $0x3a0] sm:$0xff] }
 0x163   : > { %1036 = vmatpush.msrb.mxu1 %v912_v28  ;;  %1076 = vmatpush.msrb.mxu3 %v913_v30  ;;  %v721_v0 = vld [vmem:[#allocation15 + $0x158] sm:$0xff]  ;;  %v712_v2 = vld [vmem:[#allocation15 + $0x110] sm:$0xff]  ;;  %v922_v26 = vld [vmem:[#allocation15 + $0x7a0] sm:$0xff] }
 0x164   : > { %1017 = vmatpush.msrb.mxu0 %v776_v31  ;;  %1057 = vmatpush.msrb.mxu2 %v777_v33  ;;  %v849_v1 = vld [vmem:[#allocation15 + $0x558] sm:$0xff]  ;;  %v840_v3 = vld [vmem:[#allocation15 + $0x510] sm:$0xff]  ;;  %v795_v27 = vld [vmem:[#allocation15 + $0x3a8] sm:$0xff] }
 0x165   : > { %1037 = vmatpush.msrb.mxu1 %v904_v32  ;;  %1077 = vmatpush.msrb.mxu3 %v905_v34  ;;  %v713_v4 = vld [vmem:[#allocation15 + $0x118] sm:$0xff]  ;;  %v704_v6 = vld [vmem:[#allocation15 + $0xd0] sm:$0xff]  ;;  %v923_v28 = vld [vmem:[#allocation15 + $0x7a8] sm:$0xff] }
 0x166   : > { %1018 = vmatpush.msrb.mxu0 %v768_v35  ;;  %1058 = vmatpush.msrb.mxu2 %v769_v37  ;;  %v841_v5 = vld [vmem:[#allocation15 + $0x518] sm:$0xff]  ;;  %v832_v7 = vld [vmem:[#allocation15 + $0x4d0] sm:$0xff]  ;;  %v786_v29 = vld [vmem:[#allocation15 + $0x360] sm:$0xff] }
 0x167   : > { %1038 = vmatpush.msrb.mxu1 %v896_v36  ;;  %1078 = vmatpush.msrb.mxu3 %v897_v38  ;;  %v705_v8 = vld [vmem:[#allocation15 + $0xd8] sm:$0xff]  ;;  %v696_v61 = vld [vmem:[#allocation15 + $0x90] sm:$0xff]  ;;  %v914_v30 = vld [vmem:[#allocation15 + $0x760] sm:$0xff] }
 0x168   : > { %1019 = vmatpush.msrb.mxu0 %v760_v39  ;;  %1059 = vmatpush.msrb.mxu2 %v761_v41  ;;  %v833_v9 = vld [vmem:[#allocation15 + $0x4d8] sm:$0xff]  ;;  %v824_v14 = vld [vmem:[#allocation15 + $0x490] sm:$0xff]  ;;  %v787_v31 = vld [vmem:[#allocation15 + $0x368] sm:$0xff] }
 0x169   : > { %1039 = vmatpush.msrb.mxu1 %v888_v40  ;;  %1079 = vmatpush.msrb.mxu3 %v889_v42  ;;  %v697_v15 = vld [vmem:[#allocation15 + $0x98] sm:$0xff]  ;;  %v688_v17 = vld [vmem:[#allocation15 + $0x50] sm:$0xff]  ;;  %v915_v32 = vld [vmem:[#allocation15 + $0x768] sm:$0xff] }
 0x16a   : > { %990 = vmatmul.f32.vlgmr.msra.gmra.mxu2 %v1916_v43  ;;  %1010 = vmatmul.f32.vlgmr.msra.gmra.mxu3 %v1918_v44  ;;  %v825_v16 = vld [vmem:[#allocation15 + $0x498] sm:$0xff]  ;;  %v816_v18 = vld [vmem:[#allocation15 + $0x450] sm:$0xff]  ;;  %v778_v33 = vld [vmem:[#allocation15 + $0x320] sm:$0xff] }
 0x16b   : > { %1020 = vmatpush.msrb.mxu0 %v752_v45  ;;  %1040 = vmatpush.msrb.mxu1 %v880_v46  ;;  %v689_v11 = vld [vmem:[#allocation15 + $0x58] sm:$0xff]  ;;  %v680_v23 = vld [vmem:[#allocation15 + $0x10] sm:$0xff]  ;;  %v906_v34 = vld [vmem:[#allocation15 + $0x720] sm:$0xff] }
 0x16c   : > { %1060 = vmatpush.msrb.mxu2 %v753_v47  ;;  %1080 = vmatpush.msrb.mxu3 %v881_v48  ;;  %v817_v22 = vld [vmem:[#allocation15 + $0x458] sm:$0xff]  ;;  %v808_v12 = vld [vmem:[#allocation15 + $0x410] sm:$0xff]  ;;  %v779_v35 = vld [vmem:[#allocation15 + $0x328] sm:$0xff] }
 0x16d   : > { %1021 = vmatpush.msrb.mxu0 %v744_v49  ;;  %1041 = vmatpush.msrb.mxu1 %v872_v50  ;;  %v681_v19 = vld [vmem:[#allocation15 + $0x18] sm:$0xff]  ;;  %v907_v36 = vld [vmem:[#allocation15 + $0x728] sm:$0xff]  ;;  %v770_v37 = vld [vmem:[#allocation15 + $0x2e0] sm:$0xff] }
 0x16e   : > { %1061 = vmatpush.msrb.mxu2 %v745_v51  ;;  %1081 = vmatpush.msrb.mxu3 %v873_v52  ;;  %v809_v13 = vld [vmem:[#allocation15 + $0x418] sm:$0xff]  ;;  %v898_v38 = vld [vmem:[#allocation15 + $0x6e0] sm:$0xff]  ;;  %v771_v39 = vld [vmem:[#allocation15 + $0x2e8] sm:$0xff] }
 0x16f   : > { %1022 = vmatpush.msrb.mxu0 %v736_v53  ;;  %1042 = vmatpush.msrb.mxu1 %v864_v54  ;;  %v899_v40 = vld [vmem:[#allocation15 + $0x6e8] sm:$0xff]  ;;  %v762_v41 = vld [vmem:[#allocation15 + $0x2a0] sm:$0xff] }
 0x170   : > { %1062 = vmatpush.msrb.mxu2 %v737_v55  ;;  %1082 = vmatpush.msrb.mxu3 %v865_v56  ;;  %v890_v42 = vld [vmem:[#allocation15 + $0x6a0] sm:$0xff]  ;;  %v763_v45 = vld [vmem:[#allocation15 + $0x2a8] sm:$0xff] }
 0x171   : > { %950 = vmatmul.f32.vlgmr.msra.gmra.mxu0 %v1916_v43  ;;  %970 = vmatmul.f32.vlgmr.msra.gmra.mxu1 %v1918_v44  ;;  %v891_v46 = vld [vmem:[#allocation15 + $0x6a8] sm:$0xff]  ;;  %v754_v47 = vld [vmem:[#allocation15 + $0x260] sm:$0xff] }
 0x172   : > { %1023 = vmatpush.msrb.mxu0 %v728_v57  ;;  %1043 = vmatpush.msrb.mxu1 %v856_v58  ;;  %v882_v48 = vld [vmem:[#allocation15 + $0x660] sm:$0xff]  ;;  %v755_v49 = vld [vmem:[#allocation15 + $0x268] sm:$0xff] }
 0x173   : > { %1063 = vmatpush.msrb.mxu2 %v729_v59  ;;  %1083 = vmatpush.msrb.mxu3 %v857_v60  ;;  %v883_v50 = vld [vmem:[#allocation15 + $0x668] sm:$0xff]  ;;  %v746_v51 = vld [vmem:[#allocation15 + $0x220] sm:$0xff] }
 0x174   : > { %1024 = vmatpush.msrb.mxu0 %v720_v62  ;;  %1044 = vmatpush.msrb.mxu1 %v848_v63  ;;  %v874_v52 = vld [vmem:[#allocation15 + $0x620] sm:$0xff]  ;;  %v747_v53 = vld [vmem:[#allocation15 + $0x228] sm:$0xff] }
 0x175   : > { %1064 = vmatpush.msrb.mxu2 %v721_v0  ;;  %1084 = vmatpush.msrb.mxu3 %v849_v1  ;;  %v875_v54 = vld [vmem:[#allocation15 + $0x628] sm:$0xff]  ;;  %v738_v55 = vld [vmem:[#allocation15 + $0x1e0] sm:$0xff] }
 0x176   : > { %1025 = vmatpush.msrb.mxu0 %v712_v2  ;;  %1045 = vmatpush.msrb.mxu1 %v840_v3  ;;  %v866_v56 = vld [vmem:[#allocation15 + $0x5e0] sm:$0xff]  ;;  %v739_v57 = vld [vmem:[#allocation15 + $0x1e8] sm:$0xff] }
 0x177   : > { %1065 = vmatpush.msrb.mxu2 %v713_v4  ;;  %1085 = vmatpush.msrb.mxu3 %v841_v5  ;;  %v867_v58 = vld [vmem:[#allocation15 + $0x5e8] sm:$0xff]  ;;  %v730_v59 = vld [vmem:[#allocation15 + $0x1a0] sm:$0xff] }
 0x178   : > { %1026 = vmatpush.msrb.mxu0 %v704_v6  ;;  %1046 = vmatpush.msrb.mxu1 %v832_v7  ;;  %v858_v60 = vld [vmem:[#allocation15 + $0x5a0] sm:$0xff]  ;;  %v731_v62 = vld [vmem:[#allocation15 + $0x1a8] sm:$0xff] }
 0x179   : > { %1066 = vmatpush.msrb.mxu2 %v705_v8  ;;  %1086 = vmatpush.msrb.mxu3 %v833_v9  ;;  %v859_v63 = vld [vmem:[#allocation15 + $0x5a8] sm:$0xff]  ;;  %v722_v0 = vld [vmem:[#allocation15 + $0x160] sm:$0xff] }
 0x17a   : > { %1027 = vmatpush.msrb.mxu0 %v696_v61  ;;  %1047 = vmatpush.msrb.mxu1 %v824_v14  ;;  %v850_v1 = vld [vmem:[#allocation15 + $0x560] sm:$0xff]  ;;  %v723_v2 = vld [vmem:[#allocation15 + $0x168] sm:$0xff] }
 0x17b   : > { %1067 = vmatpush.msrb.mxu2 %v697_v15  ;;  %1087 = vmatpush.msrb.mxu3 %v825_v16  ;;  %v851_v3 = vld [vmem:[#allocation15 + $0x568] sm:$0xff]  ;;  %v714_v4 = vld [vmem:[#allocation15 + $0x120] sm:$0xff] }
 0x17c   : > { %1028 = vmatpush.msrb.mxu0 %v688_v17  ;;  %1048 = vmatpush.msrb.mxu1 %v816_v18  ;;  %v842_v5 = vld [vmem:[#allocation15 + $0x520] sm:$0xff]  ;;  %v715_v6 = vld [vmem:[#allocation15 + $0x128] sm:$0xff] }
 0x17d   : > { %1068 = vmatpush.msrb.mxu2 %v689_v11  ;;  %1088 = vmatpush.msrb.mxu3 %v817_v22  ;;  %v843_v7 = vld [vmem:[#allocation15 + $0x528] sm:$0xff]  ;;  %v706_v8 = vld [vmem:[#allocation15 + $0xe0] sm:$0xff] }
 0x17e   : > { %1029 = vmatpush.msrb.mxu0 %v680_v23  ;;  %1049 = vmatpush.msrb.mxu1 %v808_v12  ;;  %v834_v9 = vld [vmem:[#allocation15 + $0x4e0] sm:$0xff]  ;;  %v707_v61 = vld [vmem:[#allocation15 + $0xe8] sm:$0xff] }
 0x17f   : > { %1069 = vmatpush.msrb.mxu2 %v681_v19  ;;  %1089 = vmatpush.msrb.mxu3 %v809_v13  ;;  %v835_v14 = vld [vmem:[#allocation15 + $0x4e8] sm:$0xff]  ;;  %v698_v15 = vld [vmem:[#allocation15 + $0xa0] sm:$0xff] }
 0x180   : > { %1030 = vmatmul.f32.vlgmr.msrb.gmra.mxu0 %v1916_v43  ;;  %1050 = vmatmul.f32.vlgmr.msrb.gmra.mxu1 %v1918_v44  ;;  %v826_v16 = vld [vmem:[#allocation15 + $0x4a0] sm:$0xff]  ;;  %v699_v17 = vld [vmem:[#allocation15 + $0xa8] sm:$0xff] }
 0x181   : > { %1094 = vmatpush.msra.mxu0 %v802_v20  ;;  %1114 = vmatpush.msra.mxu1 %v930_v24  ;;  %v827_v18 = vld [vmem:[#allocation15 + $0x4a8] sm:$0xff]  ;;  %v690_v11 = vld [vmem:[#allocation15 + $0x60] sm:$0xff] }
 0x182   : > { %1134 = vmatpush.msra.mxu2 %v803_v21  ;;  %1154 = vmatpush.msra.mxu3 %v931_v25  ;;  %v818_v22 = vld [vmem:[#allocation15 + $0x460] sm:$0xff]  ;;  %v691_v23 = vld [vmem:[#allocation15 + $0x68] sm:$0xff]  ;;  %v804_v21 = vld [vmem:[#allocation15 + $0x3f0] sm:$0xff] }
 0x183   : > { %1070 = vmatmul.f32.vlgmr.msrb.gmra.mxu2 %v1916_v43  ;;  %1090 = vmatmul.f32.vlgmr.msrb.gmra.mxu3 %v1918_v44  ;;  %v819_v12 = vld [vmem:[#allocation15 + $0x468] sm:$0xff]  ;;  %v682_v19 = vld [vmem:[#allocation15 + $0x20] sm:$0xff]  ;;  %v932_v25 = vld [vmem:[#allocation15 + $0x7f0] sm:$0xff] }
 0x184   : > { %1095 = vmatpush.msra.mxu0 %v794_v10  ;;  %1115 = vmatpush.msra.mxu1 %v922_v26  ;;  %v810_v13 = vld [vmem:[#allocation15 + $0x420] sm:$0xff]  ;;  %v683_v20 = vld [vmem:[#allocation15 + $0x28] sm:$0xff]  ;;  %v805_v10 = vld [vmem:[#allocation15 + $0x3f8] sm:$0xff] }
 0x185   : > { %1135 = vmatpush.msra.mxu2 %v795_v27  ;;  %1155 = vmatpush.msra.mxu3 %v923_v28  ;;  %v811_v24 = vld [vmem:[#allocation15 + $0x428] sm:$0xff]  ;;  %v933_v26 = vld [vmem:[#allocation15 + $0x7f8] sm:$0xff]  ;;  %v796_v27 = vld [vmem:[#allocation15 + $0x3b0] sm:$0xff] }
 0x186   : > { %1096 = vmatpush.msra.mxu0 %v786_v29  ;;  %1116 = vmatpush.msra.mxu1 %v914_v30  ;;  %v924_v28 = vld [vmem:[#allocation15 + $0x7b0] sm:$0xff]  ;;  %v797_v29 = vld [vmem:[#allocation15 + $0x3b8] sm:$0xff] }
 0x187   : > { %1136 = vmatpush.msra.mxu2 %v787_v31  ;;  %1156 = vmatpush.msra.mxu3 %v915_v32  ;;  %v925_v30 = vld [vmem:[#allocation15 + $0x7b8] sm:$0xff]  ;;  %v788_v31 = vld [vmem:[#allocation15 + $0x370] sm:$0xff] }
 0x188   : > { %1097 = vmatpush.msra.mxu0 %v778_v33  ;;  %1117 = vmatpush.msra.mxu1 %v906_v34  ;;  %v916_v32 = vld [vmem:[#allocation15 + $0x770] sm:$0xff]  ;;  %v789_v33 = vld [vmem:[#allocation15 + $0x378] sm:$0xff] }
 0x189   : > { %1137 = vmatpush.msra.mxu2 %v779_v35  ;;  %1157 = vmatpush.msra.mxu3 %v907_v36  ;;  %v917_v34 = vld [vmem:[#allocation15 + $0x778] sm:$0xff]  ;;  %v780_v35 = vld [vmem:[#allocation15 + $0x330] sm:$0xff] }
 0x18a   : > { %1098 = vmatpush.msra.mxu0 %v770_v37  ;;  %1118 = vmatpush.msra.mxu1 %v898_v38  ;;  %v908_v36 = vld [vmem:[#allocation15 + $0x730] sm:$0xff]  ;;  %v781_v37 = vld [vmem:[#allocation15 + $0x338] sm:$0xff] }
 0x18b   : > { %1138 = vmatpush.msra.mxu2 %v771_v39  ;;  %1158 = vmatpush.msra.mxu3 %v899_v40  ;;  %v909_v38 = vld [vmem:[#allocation15 + $0x738] sm:$0xff]  ;;  %v772_v39 = vld [vmem:[#allocation15 + $0x2f0] sm:$0xff] }
 0x18c   : > { %1099 = vmatpush.msra.mxu0 %v762_v41  ;;  %1119 = vmatpush.msra.mxu1 %v890_v42  ;;  %v900_v40 = vld [vmem:[#allocation15 + $0x6f0] sm:$0xff]  ;;  %v773_v41 = vld [vmem:[#allocation15 + $0x2f8] sm:$0xff] }
 0x18d   : > { %1139 = vmatpush.msra.mxu2 %v763_v45  ;;  %1159 = vmatpush.msra.mxu3 %v891_v46  ;;  %v901_v42 = vld [vmem:[#allocation15 + $0x6f8] sm:$0xff]  ;;  %v764_v45 = vld [vmem:[#allocation15 + $0x2b0] sm:$0xff] }
 0x18e   : > { %1100 = vmatpush.msra.mxu0 %v754_v47  ;;  %1120 = vmatpush.msra.mxu1 %v882_v48  ;;  %v892_v46 = vld [vmem:[#allocation15 + $0x6b0] sm:$0xff]  ;;  %v765_v47 = vld [vmem:[#allocation15 + $0x2b8] sm:$0xff] }
 0x18f   : > { %1140 = vmatpush.msra.mxu2 %v755_v49  ;;  %1160 = vmatpush.msra.mxu3 %v883_v50  ;;  %v893_v48 = vld [vmem:[#allocation15 + $0x6b8] sm:$0xff]  ;;  %v756_v49 = vld [vmem:[#allocation15 + $0x270] sm:$0xff] }
 0x190   : > { %1101 = vmatpush.msra.mxu0 %v746_v51  ;;  %1121 = vmatpush.msra.mxu1 %v874_v52  ;;  %v884_v50 = vld [vmem:[#allocation15 + $0x670] sm:$0xff]  ;;  %v757_v51 = vld [vmem:[#allocation15 + $0x278] sm:$0xff] }
 0x191   : > { %1141 = vmatpush.msra.mxu2 %v747_v53  ;;  %1161 = vmatpush.msra.mxu3 %v875_v54  ;;  %v885_v52 = vld [vmem:[#allocation15 + $0x678] sm:$0xff]  ;;  %v748_v53 = vld [vmem:[#allocation15 + $0x230] sm:$0xff] }
 0x192   : > { %1102 = vmatpush.msra.mxu0 %v738_v55  ;;  %1122 = vmatpush.msra.mxu1 %v866_v56  ;;  %v876_v54 = vld [vmem:[#allocation15 + $0x630] sm:$0xff]  ;;  %v749_v55 = vld [vmem:[#allocation15 + $0x238] sm:$0xff] }
 0x193   : > { %1142 = vmatpush.msra.mxu2 %v739_v57  ;;  %1162 = vmatpush.msra.mxu3 %v867_v58  ;;  %v877_v56 = vld [vmem:[#allocation15 + $0x638] sm:$0xff]  ;;  %v740_v57 = vld [vmem:[#allocation15 + $0x1f0] sm:$0xff] }
 0x194   : > { %1103 = vmatpush.msra.mxu0 %v730_v59  ;;  %1123 = vmatpush.msra.mxu1 %v858_v60  ;;  %v868_v58 = vld [vmem:[#allocation15 + $0x5f0] sm:$0xff]  ;;  %v741_v59 = vld [vmem:[#allocation15 + $0x1f8] sm:$0xff] }
 0x195   : > { %1143 = vmatpush.msra.mxu2 %v731_v62  ;;  %1163 = vmatpush.msra.mxu3 %v859_v63  ;;  %v869_v60 = vld [vmem:[#allocation15 + $0x5f8] sm:$0xff]  ;;  %v732_v62 = vld [vmem:[#allocation15 + $0x1b0] sm:$0xff] }
 0x196   : > { %1104 = vmatpush.msra.mxu0 %v722_v0  ;;  %1124 = vmatpush.msra.mxu1 %v850_v1  ;;  %v860_v63 = vld [vmem:[#allocation15 + $0x5b0] sm:$0xff]  ;;  %v733_v0 = vld [vmem:[#allocation15 + $0x1b8] sm:$0xff] }
 0x197   : > { %1144 = vmatpush.msra.mxu2 %v723_v2  ;;  %1164 = vmatpush.msra.mxu3 %v851_v3  ;;  %v861_v1 = vld [vmem:[#allocation15 + $0x5b8] sm:$0xff]  ;;  %v724_v2 = vld [vmem:[#allocation15 + $0x170] sm:$0xff] }
 0x198   : > { %1105 = vmatpush.msra.mxu0 %v714_v4  ;;  %1125 = vmatpush.msra.mxu1 %v842_v5  ;;  %v852_v3 = vld [vmem:[#allocation15 + $0x570] sm:$0xff]  ;;  %v725_v4 = vld [vmem:[#allocation15 + $0x178] sm:$0xff] }
 0x199   : > { %1145 = vmatpush.msra.mxu2 %v715_v6  ;;  %1165 = vmatpush.msra.mxu3 %v843_v7  ;;  %v853_v5 = vld [vmem:[#allocation15 + $0x578] sm:$0xff]  ;;  %v716_v6 = vld [vmem:[#allocation15 + $0x130] sm:$0xff] }
 0x19a   : > { %1106 = vmatpush.msra.mxu0 %v706_v8  ;;  %1126 = vmatpush.msra.mxu1 %v834_v9  ;;  %v844_v7 = vld [vmem:[#allocation15 + $0x530] sm:$0xff]  ;;  %v717_v8 = vld [vmem:[#allocation15 + $0x138] sm:$0xff] }
 0x19b   : > { %1146 = vmatpush.msra.mxu2 %v707_v61  ;;  %1166 = vmatpush.msra.mxu3 %v835_v14  ;;  %v845_v9 = vld [vmem:[#allocation15 + $0x538] sm:$0xff]  ;;  %v708_v61 = vld [vmem:[#allocation15 + $0xf0] sm:$0xff] }
 0x19c   : > { %1107 = vmatpush.msra.mxu0 %v698_v15  ;;  %1127 = vmatpush.msra.mxu1 %v826_v16  ;;  %v836_v14 = vld [vmem:[#allocation15 + $0x4f0] sm:$0xff]  ;;  %v709_v15 = vld [vmem:[#allocation15 + $0xf8] sm:$0xff] }
 0x19d   : > { %1147 = vmatpush.msra.mxu2 %v699_v17  ;;  %1167 = vmatpush.msra.mxu3 %v827_v18  ;;  %v837_v16 = vld [vmem:[#allocation15 + $0x4f8] sm:$0xff]  ;;  %v700_v17 = vld [vmem:[#allocation15 + $0xb0] sm:$0xff] }
 0x19e   : > { %1108 = vmatpush.msra.mxu0 %v690_v11  ;;  %1128 = vmatpush.msra.mxu1 %v818_v22  ;;  %v828_v18 = vld [vmem:[#allocation15 + $0x4b0] sm:$0xff]  ;;  %v701_v11 = vld [vmem:[#allocation15 + $0xb8] sm:$0xff] }
 0x19f   : > { %1148 = vmatpush.msra.mxu2 %v691_v23  ;;  %1168 = vmatpush.msra.mxu3 %v819_v12  ;;  %v829_v22 = vld [vmem:[#allocation15 + $0x4b8] sm:$0xff]  ;;  %v692_v23 = vld [vmem:[#allocation15 + $0x70] sm:$0xff] }
 0x1a0   : > { %1109 = vmatpush.msra.mxu0 %v682_v19  ;;  %1129 = vmatpush.msra.mxu1 %v810_v13  ;;  %v820_v12 = vld [vmem:[#allocation15 + $0x470] sm:$0xff]  ;;  %v693_v19 = vld [vmem:[#allocation15 + $0x78] sm:$0xff] }
 0x1a1   : > { %1149 = vmatpush.msra.mxu2 %v683_v20  ;;  %1169 = vmatpush.msra.mxu3 %v811_v24  ;;  %v821_v13 = vld [vmem:[#allocation15 + $0x478] sm:$0xff]  ;;  %v684_v20 = vld [vmem:[#allocation15 + $0x30] sm:$0xff] }
 0x1a2   : > { %1174 = vmatpush.msrb.mxu0 %v804_v21  ;;  %1194 = vmatpush.msrb.mxu1 %v932_v25  ;;  %v812_v24 = vld [vmem:[#allocation15 + $0x430] sm:$0xff]  ;;  %v685_v21 = vld [vmem:[#allocation15 + $0x38] sm:$0xff] }
 0x1a3   : > { %1214 = vmatpush.msrb.mxu2 %v805_v10  ;;  %1234 = vmatpush.msrb.mxu3 %v933_v26  ;;  %v813_v25 = vld [vmem:[#allocation15 + $0x438] sm:$0xff] }
 0x1a4   : > { %1150 = vmatmul.f32.vlgmr.msra.gmra.mxu2 %v1916_v43  ;;  %1170 = vmatmul.f32.vlgmr.msra.gmra.mxu3 %v1918_v44 }
 0x1a5   : > { %1175 = vmatpush.msrb.mxu0 %v796_v27  ;;  %1195 = vmatpush.msrb.mxu1 %v924_v28  ;;  %v1258_v27 = vld [vmem:[%s1937_s29 + $0x8] sm:$0xff] }
 0x1a6   : > { %1215 = vmatpush.msrb.mxu2 %v797_v29  ;;  %1235 = vmatpush.msrb.mxu3 %v925_v30  ;;  %v1257_v30 = vld [vmem:[%s1937_s29] sm:$0xff] }
 0x1a7   : > { %1176 = vmatpush.msrb.mxu0 %v788_v31  ;;  %1196 = vmatpush.msrb.mxu1 %v916_v32 }
 0x1a8   : > { %1216 = vmatpush.msrb.mxu2 %v789_v33  ;;  %1236 = vmatpush.msrb.mxu3 %v917_v34 }
 0x1a9   : > { %1177 = vmatpush.msrb.mxu0 %v780_v35  ;;  %1197 = vmatpush.msrb.mxu1 %v908_v36 }
 0x1aa   : > { %1217 = vmatpush.msrb.mxu2 %v781_v37  ;;  %1237 = vmatpush.msrb.mxu3 %v909_v38 }
 0x1ab   : > { %1110 = vmatmul.f32.vlgmr.msra.gmra.mxu0 %v1916_v43  ;;  %1130 = vmatmul.f32.vlgmr.msra.gmra.mxu1 %v1918_v44 }
 0x1ac   : > { %1178 = vmatpush.msrb.mxu0 %v772_v39  ;;  %1198 = vmatpush.msrb.mxu1 %v900_v40 }
 0x1ad   : > { %1218 = vmatpush.msrb.mxu2 %v773_v41  ;;  %1238 = vmatpush.msrb.mxu3 %v901_v42  ;;  %v1259_v41 = vld [vmem:[%s1937_s29 + $0x10] sm:$0xff] }
 0x1ae   : > { %1179 = vmatpush.msrb.mxu0 %v764_v45  ;;  %1199 = vmatpush.msrb.mxu1 %v892_v46 }
 0x1af   : > { %1219 = vmatpush.msrb.mxu2 %v765_v47  ;;  %1239 = vmatpush.msrb.mxu3 %v893_v48 }
 0x1b0   : > { %1180 = vmatpush.msrb.mxu0 %v756_v49  ;;  %1200 = vmatpush.msrb.mxu1 %v884_v50 }
 0x1b1   : > { %1220 = vmatpush.msrb.mxu2 %v757_v51  ;;  %1240 = vmatpush.msrb.mxu3 %v885_v52 }
 0x1b2   : > { %1181 = vmatpush.msrb.mxu0 %v748_v53  ;;  %1201 = vmatpush.msrb.mxu1 %v876_v54 }
 0x1b3   : > { %1221 = vmatpush.msrb.mxu2 %v749_v55  ;;  %1241 = vmatpush.msrb.mxu3 %v877_v56  ;;  %v1260_v55 = vld [vmem:[%s1937_s29 + $0x18] sm:$0xff] }
 0x1b4   : > { %1182 = vmatpush.msrb.mxu0 %v740_v57  ;;  %1202 = vmatpush.msrb.mxu1 %v868_v58 }
 0x1b5   : > { %1222 = vmatpush.msrb.mxu2 %v741_v59  ;;  %1242 = vmatpush.msrb.mxu3 %v869_v60 }
 0x1b6   : > { %1183 = vmatpush.msrb.mxu0 %v732_v62  ;;  %1203 = vmatpush.msrb.mxu1 %v860_v63 }
 0x1b7   : > { %1223 = vmatpush.msrb.mxu2 %v733_v0  ;;  %1243 = vmatpush.msrb.mxu3 %v861_v1 }
 0x1b8   : > { %1184 = vmatpush.msrb.mxu0 %v724_v2  ;;  %1204 = vmatpush.msrb.mxu1 %v852_v3 }
 0x1b9   : > { %1224 = vmatpush.msrb.mxu2 %v725_v4  ;;  %1244 = vmatpush.msrb.mxu3 %v853_v5 }
 0x1ba   : > { %1185 = vmatpush.msrb.mxu0 %v716_v6  ;;  %1205 = vmatpush.msrb.mxu1 %v844_v7 }
 0x1bb   : > { %1225 = vmatpush.msrb.mxu2 %v717_v8  ;;  %1245 = vmatpush.msrb.mxu3 %v845_v9  ;;  %v1277_v9 = vld [vmem:[#allocation5 + $0x8] sm:$0xff] }
 0x1bc   : > { %1186 = vmatpush.msrb.mxu0 %v708_v61  ;;  %1206 = vmatpush.msrb.mxu1 %v836_v14 }
 0x1bd   : > { %1226 = vmatpush.msrb.mxu2 %v709_v15  ;;  %1246 = vmatpush.msrb.mxu3 %v837_v16 }
 0x1be   : > { %1187 = vmatpush.msrb.mxu0 %v700_v17  ;;  %1207 = vmatpush.msrb.mxu1 %v828_v18 }
 0x1bf   : > { %1227 = vmatpush.msrb.mxu2 %v701_v11  ;;  %1247 = vmatpush.msrb.mxu3 %v829_v22 }
 0x1c0   : > { %1188 = vmatpush.msrb.mxu0 %v692_v23  ;;  %1208 = vmatpush.msrb.mxu1 %v820_v12 }
 0x1c1   : > { %1228 = vmatpush.msrb.mxu2 %v693_v19  ;;  %1248 = vmatpush.msrb.mxu3 %v821_v13 }
 0x1c2   : > { %1189 = vmatpush.msrb.mxu0 %v684_v20  ;;  %1209 = vmatpush.msrb.mxu1 %v812_v24 }
 0x1c3   : > { %1229 = vmatpush.msrb.mxu2 %v685_v21  ;;  %1249 = vmatpush.msrb.mxu3 %v813_v25 }
 0x1c4   : > { %1190 = vmatmul.f32.vlgmr.msrb.gmra.mxu0 %v1916_v43  ;;  %1210 = vmatmul.f32.vlgmr.msrb.gmra.mxu1 %v1918_v44 }
 0x1c5   : > { %1230 = vmatmul.f32.vlgmr.msrb.gmra.mxu2 %v1916_v43  ;;  %1250 = vmatmul.f32.vlgmr.msrb.gmra.mxu3 %v1918_v44 }
 0x1ed   : > { %v991_v10 = vpop.f32.mrf.mxu2  ;;  %v1011_v26 = vpop.f32.mrf.mxu3 }
 0x1ee   : > { %v951_v28 = vpop.f32.mrf.mxu0  ;;  %v971_v29 = vpop.f32.mrf.mxu1  ;;  %v1012_v31 = vadd.f32 %v1011_v26, %v991_v10 }
 0x1ef   : > { %v972_v32 = vadd.f32 %v971_v29, %v951_v28 }
 0x1f0   : > { %v1262_v33 = vadd.f32 %v1258_v27, %v1012_v31 }
 0x1f1   : > { %v1261_v34 = vadd.f32 %v1257_v30, %v972_v32  ;;  %v1270_v30 = vld [vmem:[%s1954_s10 + $0x8] sm:$0xff] }
 0x1f2   : > { %v1457_v35 = vmul.f32 -1.442695, %v1262_v33  ;;  %v1269_v33 = vld [vmem:[%s1954_s10] sm:$0xff] }
 0x1f3   : > { %v1456_v43 = vmul.f32 -1.442695, %v1261_v34 }
 0x1f4   : > { %1494 = vpow2.f32 %v1457_v35 }
 0x1f5   : > { %1496 = vpow2.f32 %v1456_v43 }
 0x1fa   : > { %v1495_v44 = vpop.eup %1494 }
 0x1fb   : > { %v1497_v36 = vpop.eup %1496  ;;  %v1289_v37 = vadd.f32 1.0, %v1495_v44 }
 0x1fc   : > { %v1288_v38 = vadd.f32 1.0, %v1497_v36 }
 0x1fd   : > { %1498 = vrcp.f32 %v1289_v37  ;;  %v1031_v39 = vpop.f32.mrf.mxu0  ;;  %v1051_v40 = vpop.f32.mrf.mxu1  ;;  %vm1311_vm0 = vweird.f32 %v1289_v37  ;;  %v1317_v52 = vand.u32 2147483648, %v1289_v37  ;;  %v1315_v56 = vand.u32 2147483647, %v1289_v37 }
 0x1fe   : > { %1500 = vrcp.f32 %v1288_v38  ;;  %v1052_v42 = vadd.f32 %v1051_v40, %v1031_v39  ;;  %v1302_v59 = vand.u32 2147483648, %v1288_v38  ;;  %vm1296_vm2 = vweird.f32 %v1288_v38 }
 0x1ff   : > { %v1300_v62 = vand.u32 2147483647, %v1288_v38  ;;  %v1318_v3 = vor.u32 1.1754944e-38, %v1317_v52  ;;  %vm1316_vm5 = vcmp.eq.f32.partialorder %v1315_v56, 8.507059e+37 }
 0x200   : > { %v1263_v45 = vadd.f32 %v1259_v41, %v1052_v42  ;;  %v1303_v7 = vor.u32 1.1754944e-38, %v1302_v59  ;;  %v1272_v59 = vld [vmem:[%s1954_s10 + $0x18] sm:$0xff] }
 0x201   : > { %vm1301_vm7 = vcmp.eq.f32.partialorder %v1300_v62, 8.507059e+37 }
 0x202   : > { %v1458_v46 = vmul.f32 -1.442695, %v1263_v45 }
 0x203   : > { %v1499_v47 = vpop.eup %1498 }
 0x204   : > { %v1501_v48 = vpop.eup %1500  ;;  %v1307_v49 = vmul.f32 %v1499_v47, %v1289_v37  ;;  %1502 = vpow2.f32 %v1458_v46  ;;  %vm1312_vm1 = vweird.f32 %v1499_v47 }
 0x205   : > { %v1292_v50 = vmul.f32 %v1501_v48, %v1288_v38  ;;  %vm1297_vm3 = vweird.f32 %v1501_v48  ;;  %vm1944_vm4 = vmor %vm1311_vm0, %vm1312_vm1 }
 0x206   : > { %v1308_v51 = vsub.f32 1.0, %v1307_v49  ;;  %v1071_v53 = vpop.f32.mrf.mxu2  ;;  %v1091_v54 = vpop.f32.mrf.mxu3  ;;  %vm1298_vm6 = vmor %vm1296_vm2, %vm1297_vm3 }
 0x207   : > { %v1293_v57 = vsub.f32 1.0, %v1292_v50  ;;  %v1092_v58 = vadd.f32 %v1091_v54, %v1071_v53  ;;  %v1271_v50 = vld [vmem:[%s1954_s10 + $0x10] sm:$0xff] }
 0x208   : > { %v1309_v60 = vmul.f32 %v1499_v47, %v1308_v51 }
 0x209   : > { %v1264_v0 = vadd.f32 %v1260_v55, %v1092_v58  ;;  %v1294_v1 = vmul.f32 %v1501_v48, %v1293_v57 }
 0x20a   : > { %v1503_v2 = vpop.eup %1502  ;;  %v1310_v4 = vadd.f32 %v1499_v47, %v1309_v60 }
 0x20b   : > { %v1290_v5 = vadd.f32 1.0, %v1503_v2  ;;  %v1295_v6 = vadd.f32 %v1501_v48, %v1294_v1  ;;  %1504 = vtanh.f32 %v1264_v0 }
 0x20c   : > { %v1314_v8 = vsel %vm1944_vm4, %v1499_v47, %v1310_v4 }
 0x20d   : > { %1506 = vrcp.f32 %v1290_v5  ;;  %v1299_v61 = vsel %vm1298_vm6, %v1501_v48, %v1295_v6  ;;  %v1319_v14 = vsel %vm1316_vm5, %v1318_v3, %v1314_v8  ;;  %v1332_v12 = vand.u32 2147483648, %v1290_v5 }
 0x20e   : > { %v1304_v15 = vsel %vm1301_vm7, %v1303_v7, %v1299_v61  ;;  %v1337_v16 = vmul.f32 %v1319_v14, %v1277_v9  ;;  %vm1326_vm8 = vweird.f32 %v1290_v5  ;;  %v1330_v13 = vand.u32 2147483647, %v1290_v5 }
 0x20f   : > { %v1333_v24 = vor.u32 1.1754944e-38, %v1332_v12 }
 0x210   : > { %vm1331_vm11 = vcmp.eq.f32.partialorder %v1330_v13, 8.507059e+37 }
 0x211   : > { %v1505_v17 = vpop.eup %1504 }
 0x212   : > { %v1338_v18 = vmul.f32 %v1505_v17, %v1304_v15 }
 0x213   : > { %v1507_v11 = vpop.eup %1506 }
 0x214   : > { %v1322_v22 = vmul.f32 %v1507_v11, %v1290_v5  ;;  %v1339_v23 = vadd.f32 %v1338_v18, %v1337_v16  ;;  %vm1327_vm9 = vweird.f32 %v1507_v11  ;;  %v1278_v16 = vld [vmem:[#allocation5] sm:$0xff] }
 0x215   : > { %vm1328_vm10 = vmor %vm1326_vm8, %vm1327_vm9 }
 0x216   : > { %v1323_v19 = vsub.f32 1.0, %v1322_v22  ;;  %1407 = vst [vmem:[#allocation5 + $0x8] sm:$0xff] %v1339_v23  ;;  %1508 = vtanh.f32 %v1339_v23 }
 0x218   : > { %v1324_v20 = vmul.f32 %v1507_v11, %v1323_v19 }
 0x21a   : > { %v1325_v21 = vadd.f32 %v1507_v11, %v1324_v20 }
 0x21c   : > { %v1329_v25 = vsel %vm1328_vm10, %v1507_v11, %v1325_v21  ;;  %v1509_v10 = vpop.eup %1508 }
 0x21d   : > { %v1334_v26 = vsel %vm1331_vm11, %v1333_v24, %v1329_v25 }
 0x21e   : > { %v1341_v27 = vmul.f32 %v1509_v10, %v1334_v26 }
 0x220   : > { %1405 = vst [vmem:[#allocation4] sm:$0xff] %v1341_v27 }
 0x221   : > { %1412 = vst [vmem:[%s1411_s8] sm:$0xff] %v1341_v27 }
 0x227   : > { %v1151_v28 = vpop.f32.mrf.mxu2  ;;  %v1171_v29 = vpop.f32.mrf.mxu3 }
 0x228   : > { %v1111_v31 = vpop.f32.mrf.mxu0  ;;  %v1131_v32 = vpop.f32.mrf.mxu1  ;;  %v1172_v34 = vadd.f32 %v1171_v29, %v1151_v28 }
 0x229   : > { %v1132_v35 = vadd.f32 %v1131_v32, %v1111_v31 }
 0x22a   : > { %v1274_v43 = vadd.f32 %v1270_v30, %v1172_v34 }
 0x22b   : > { %v1273_v44 = vadd.f32 %v1269_v33, %v1132_v35 }
 0x22c   : > { %v1460_v36 = vmul.f32 -1.442695, %v1274_v43 }
 0x22d   : > { %v1459_v37 = vmul.f32 -1.442695, %v1273_v44 }
 0x22e   : > { %1510 = vpow2.f32 %v1460_v36 }
 0x22f   : > { %1512 = vpow2.f32 %v1459_v37 }
 0x234   : > { %v1511_v38 = vpop.eup %1510 }
 0x235   : > { %v1513_v39 = vpop.eup %1512  ;;  %v1352_v40 = vadd.f32 1.0, %v1511_v38 }
 0x236   : > { %v1351_v41 = vadd.f32 1.0, %v1513_v39 }
 0x237   : > { %1514 = vrcp.f32 %v1352_v40  ;;  %vm1374_vm12 = vweird.f32 %v1352_v40  ;;  %v1380_v62 = vand.u32 2147483648, %v1352_v40  ;;  %v1378_v1 = vand.u32 2147483647, %v1352_v40 }
 0x238   : > { %1516 = vrcp.f32 %v1351_v41  ;;  %vm1359_vm14 = vweird.f32 %v1351_v41  ;;  %v1365_v4 = vand.u32 2147483648, %v1351_v41  ;;  %v1363_v6 = vand.u32 2147483647, %v1351_v41 }
 0x239   : > { %v1381_v7 = vor.u32 1.1754944e-38, %v1380_v62  ;;  %vm1379_vm2 = vcmp.eq.f32.partialorder %v1378_v1, 8.507059e+37 }
 0x23a   : > { %v1366_v14 = vor.u32 1.1754944e-38, %v1365_v4  ;;  %vm1364_vm3 = vcmp.eq.f32.partialorder %v1363_v6, 8.507059e+37 }
 0x23d   : > { %v1515_v42 = vpop.eup %1514 }
 0x23e   : > { %v1517_v45 = vpop.eup %1516  ;;  %v1370_v46 = vmul.f32 %v1515_v42, %v1352_v40  ;;  %vm1375_vm13 = vweird.f32 %v1515_v42 }
 0x23f   : > { %v1355_v47 = vmul.f32 %v1517_v45, %v1351_v41  ;;  %vm1360_vm15 = vweird.f32 %v1517_v45  ;;  %vm1960_vm0 = vmor %vm1374_vm12, %vm1375_vm13 }
 0x240   : > { %v1371_v51 = vsub.f32 1.0, %v1370_v46  ;;  %vm1361_vm1 = vmor %vm1359_vm14, %vm1360_vm15 }
 0x241   : > { %v1191_v48 = vpop.f32.mrf.mxu0  ;;  %v1211_v49 = vpop.f32.mrf.mxu1  ;;  %v1356_v53 = vsub.f32 1.0, %v1355_v47 }
 0x242   : > { %v1212_v52 = vadd.f32 %v1211_v49, %v1191_v48  ;;  %v1372_v55 = vmul.f32 %v1515_v42, %v1371_v51 }
 0x243   : > { %v1357_v60 = vmul.f32 %v1517_v45, %v1356_v53 }
 0x244   : > { %v1275_v54 = vadd.f32 %v1271_v50, %v1212_v52  ;;  %v1373_v0 = vadd.f32 %v1515_v42, %v1372_v55 }
 0x245   : > { %v1358_v5 = vadd.f32 %v1517_v45, %v1357_v60 }
 0x246   : > { %v1461_v56 = vmul.f32 -1.442695, %v1275_v54  ;;  %v1377_v9 = vsel %vm1960_vm0, %v1515_v42, %v1373_v0 }
 0x247   : > { %v1362_v15 = vsel %vm1361_vm1, %v1517_v45, %v1358_v5  ;;  %v1382_v17 = vsel %vm1379_vm2, %v1381_v7, %v1377_v9 }
 0x248   : > { %1518 = vpow2.f32 %v1461_v56  ;;  %v1231_v57 = vpop.f32.mrf.mxu2  ;;  %v1251_v58 = vpop.f32.mrf.mxu3  ;;  %v1367_v11 = vsel %vm1364_vm3, %v1366_v14, %v1362_v15  ;;  %v1400_v22 = vmul.f32 %v1382_v17, %v1278_v16 }
 0x249   : > { %v1252_v63 = vadd.f32 %v1251_v58, %v1231_v57 }
 0x24b   : > { %v1276_v3 = vadd.f32 %v1272_v59, %v1252_v63 }
 0x24d   : > { %1520 = vtanh.f32 %v1276_v3 }
 0x24e   : > { %v1519_v8 = vpop.eup %1518 }
 0x24f   : > { %v1353_v61 = vadd.f32 1.0, %v1519_v8 }
 0x251   : > { %1522 = vrcp.f32 %v1353_v61  ;;  %v1395_v24 = vand.u32 2147483648, %v1353_v61  ;;  %v1393_v25 = vand.u32 2147483647, %v1353_v61  ;;  %vm1389_vm5 = vweird.f32 %v1353_v61 }
 0x253   : > { %v1521_v18 = vpop.eup %1520  ;;  %v1396_v26 = vor.u32 1.1754944e-38, %v1395_v24  ;;  %vm1394_vm7 = vcmp.eq.f32.partialorder %v1393_v25, 8.507059e+37 }
 0x254   : > { %v1401_v23 = vmul.f32 %v1521_v18, %v1367_v11 }
 0x256   : > { %v1402_v12 = vadd.f32 %v1401_v23, %v1400_v22 }
 0x257   : > { %v1523_v19 = vpop.eup %1522 }
 0x258   : > { %v1385_v13 = vmul.f32 %v1523_v19, %v1353_v61  ;;  %1408 = vst [vmem:[#allocation5] sm:$0xff] %v1402_v12  ;;  %1524 = vtanh.f32 %v1402_v12  ;;  %vm1390_vm4 = vweird.f32 %v1523_v19 }
 0x259   : > { %vm1391_vm6 = vmor %vm1389_vm5, %vm1390_vm4 }
 0x25a   : > { %v1386_v20 = vsub.f32 1.0, %v1385_v13 }
 0x25c   : > { %v1387_v21 = vmul.f32 %v1523_v19, %v1386_v20 }
 0x25e   : > { %v1388_v10 = vadd.f32 %v1523_v19, %v1387_v21  ;;  %v1525_v28 = vpop.eup %1524 }
 0x260   : > { %v1392_v27 = vsel %vm1391_vm6, %v1523_v19, %v1388_v10 }
 0x261   : > { %v1397_v29 = vsel %vm1394_vm7, %v1396_v26, %v1392_v27  ;;  %672 = sbr.rel (!%p670_p0) target bundleno = 317 (0x13d), region = 80 }
 0x262   : > { %v1404_v30 = vmul.f32 %v1525_v28, %v1397_v29 }
 0x264   : > { %1406 = vst [vmem:[#allocation4 + $0x8] sm:$0xff] %v1404_v30 }
 0x265   : > { %1416 = vst [vmem:[%s1415_s1 + $0x8] sm:$0xff] %v1404_v30 }
 0x266   :  { %1429 = dma.vmem_to_hbm [thread:$0]  %s1422_s15, 2048, %s1424_s14, [#allocation8], %s1726_s16, %s1726_s16, %s1727_s17  }
 0x267   :  { %1706 = dma.done.wait [#allocation8], 2048  }
 0x268   :  { %1707 = vsyncadd [#allocation8], 4294965248 }
 0x269   :  { %1434 = vsyncpa [#allocation7], 1 }
 0x26a   :  { %1435 = vsyncpa [#allocation10], 1 }
 0x26b   :  { %1436 = vsyncpa [#allocation13], 1 }
 0x26c   :  { %1437 = vsyncpa [#allocation16], 1 }
 0x26d   :  { %1438 = vsyncpa [#allocation8], 1 }

</bundles_post_ra>
